<compile_context>
chip_gen: v7x
topology: tpu7x:2x2x1
jax: 0.10.0
libtpu: 0.0.40
codegen_flags: <defaults>
</compile_context>

<pallas_src>
import functools

import jax
import jax.numpy as jnp
import numpy as np
from jax.experimental import pallas as pl
from jax.experimental.pallas import tpu as pltpu


# Matmul operand dtype.  Switch to jnp.bfloat16 on v6e/v7x to halve vreg/DMA
# pressure (accumulation stays f32 either way).  f32 default keeps the
# correctness check tight and matches v5e's f32-only VPU epilogue.
MATMUL_DTYPE = jnp.float32


# -----------------------------------------------------------------------------
# Fused kernel: all conv layers for one image, activations resident on-chip.
# -----------------------------------------------------------------------------
def _fused_cnn_kernel(x_ref, w_ref, b_ref, a_ref, mask_ref, o_ref, col_ref, *,
                      n_layers, w_pad):
    # x_ref:    (1, Cmax, P)        zero-halo, channel-padded, flattened image
    # w_ref:    (L, Cmax, 9*Cmax)   per-layer packed weights W[co, tap*Cmax+ci]
    # b_ref:    (L, Cmax, 1)        bias
    # a_ref:    (L, Cmax, 1)        PReLU slope (last layer == 1.0 -> identity)
    # mask_ref: (1, P)              1.0 at interior pixels, 0.0 on halo / tail
    # o_ref:    (1, Cmax, P)
    # col_ref:  (9*Cmax, P)         VMEM im2col scratch (reused every layer)
    mask = mask_ref[...]                              # (1, P)
    act = x_ref[0].astype(jnp.float32)                # (Cmax, P)
    cmax, p = act.shape
    # Tap order (dh, dw) row-major; shift in flattened padded-image coords.
    shifts = [(dh - 1) * w_pad + (dw - 1) for dh in range(3) for dw in range(3)]

    for layer in range(n_layers):
        lhs = act.astype(MATMUL_DTYPE)
        # im2col over the 9 taps: lane-rotate and stack along sublanes.
        for t, shift in enumerate(shifts):
            if shift == 0:
                rolled = lhs
            else:
                # rolled[q] = lhs[q + shift]; the rotation wrap never lands on
                # an interior output position (|shift| <= Wp + 1, halo is zero).
                rolled = pltpu.roll(lhs, shift=(-shift) % p, axis=1)
            col_ref[pl.ds(t * cmax, cmax), :] = rolled
        wt = w_ref[layer].astype(MATMUL_DTYPE)                    # (Cmax, 9*Cmax)
        acc = jnp.dot(wt, col_ref[...],                           # one MXU matmul
                      preferred_element_type=jnp.float32)
        acc = acc + b_ref[layer]                                  # (Cmax,1) bcast
        acc = jnp.where(acc >= 0, acc, a_ref[layer] * acc)        # PReLU
        act = acc * mask                                          # re-zero halo

    o_ref[0] = act.astype(o_ref.dtype)


# -----------------------------------------------------------------------------
# Wrapper: pack params / layout once, run the fused kernel, unpack.
# -----------------------------------------------------------------------------
def simple_cnn_forward(x_nchw, params):
    """Forward pass matching SimpleCNN.forward (input/output NCHW)."""
    N, c_in, H, W = x_nchw.shape
    Hp, Wp = H + 2, W + 2
    P = Hp * Wp
    P_pad = ((P + 127) // 128) * 128
    L = len(params)
    c_max = max(max(w.shape[2], w.shape[3]) for (w, _, _) in params)
    c_out = params[-1][0].shape[3]

    # Input: zero halo + channel pad + flatten spatial + pad lanes to 128-mult.
    xp = jnp.pad(x_nchw, ((0, 0), (0, c_max - c_in), (1, 1), (1, 1)))
    xf = jnp.pad(xp.reshape(N, c_max, P), ((0, 0), (0, 0), (0, P_pad - P)))

    # Pack weights per layer as (Cmax, 9*Cmax): W[co, tap*Cmax + ci].
    w_layers, biases, alphas = [], [], []
    for i, (w, b, a) in enumerate(params):
        ci, co = w.shape[2], w.shape[3]
        wt = jnp.transpose(w, (0, 1, 3, 2))                      # (3,3,Cout,Cin)
        wt = jnp.pad(wt, ((0, 0), (0, 0), (0, c_max - co), (0, c_max - ci)))
        wt = wt.reshape(9, c_max, c_max).transpose(1, 0, 2)      # (Cout,9,Cin)
        w_layers.append(wt.reshape(c_max, 9 * c_max))
        biases.append(jnp.pad(b[0], (0, c_max - co)))
        if i < L - 1:
            alphas.append(jnp.pad(a[0], (0, c_max - co), constant_values=1.0))
        else:
            alphas.append(jnp.ones((c_max,), jnp.float32))       # identity PReLU
    w_all = jnp.stack(w_layers).astype(MATMUL_DTYPE)             # (L,Cmax,9*Cmax)
    b_all = jnp.stack(biases).reshape(L, c_max, 1)
    a_all = jnp.stack(alphas).reshape(L, c_max, 1)

    # Interior mask over the flattened padded image (static numpy -> constant).
    pos = np.arange(P_pad)
    row, col = pos // Wp, pos % Wp
    interior = (pos < P) & (row >= 1) & (row <= H) & (col >= 1) & (col <= W)
    mask = jnp.asarray(interior.astype(np.float32)).reshape(1, P_pad)

    kernel = functools.partial(_fused_cnn_kernel, n_layers=L, w_pad=Wp)
    out = pl.pallas_call(
        kernel,
        out_shape=jax.ShapeDtypeStruct((N, c_max, P_pad), x_nchw.dtype),
        grid_spec=pltpu.PrefetchScalarGridSpec(
            num_scalar_prefetch=0,
            grid=(N,),
            in_specs=[
                pl.BlockSpec((1, c_max, P_pad), lambda n: (n, 0, 0)),
                pl.BlockSpec((L, c_max, 9 * c_max), lambda n: (0, 0, 0)),
                pl.BlockSpec((L, c_max, 1), lambda n: (0, 0, 0)),
                pl.BlockSpec((L, c_max, 1), lambda n: (0, 0, 0)),
                pl.BlockSpec((1, P_pad), lambda n: (0, 0)),
            ],
            out_specs=pl.BlockSpec((1, c_max, P_pad), lambda n: (n, 0, 0)),
            scratch_shapes=[pltpu.VMEM((9 * c_max, P_pad), MATMUL_DTYPE)],
        ),
        compiler_params=pltpu.CompilerParams(
            dimension_semantics=("parallel",)),
    )(xf, w_all, b_all, a_all, mask)

    out = out[:, :c_out, :P].reshape(N, c_out, Hp, Wp)
    return out[:, :, 1:H + 1, 1:W + 1]                           # drop halo -> NCHW


# -----------------------------------------------------------------------------
# Parameter init (deterministic; PReLU init=0.025 per the module spec)
# -----------------------------------------------------------------------------
def init_params(key, depth=6, n_channels=8, in_chan=2, out_chan=2):
    cins = [in_chan] + [n_channels] * (depth - 1)
    couts = [n_channels] * (depth - 1) + [out_chan]
    params = []
    for ci, co in zip(cins, couts):
        key, kw, kb = jax.random.split(key, 3)
        fan_in = ci * 9
        bound = 1.0 / jnp.sqrt(fan_in)
        w = jax.random.uniform(kw, (3, 3, ci, co), jnp.float32, -bound, bound)
        b = jax.random.uniform(kb, (1, co), jnp.float32, -bound, bound)
        a = jnp.full((1, co), 0.025, jnp.float32)
        params.append((w, b, a))
    return params


# -----------------------------------------------------------------------------
# Pure-JAX reference (lax conv) for a sanity check
# -----------------------------------------------------------------------------
def reference_forward(x_nchw, params):
    x = x_nchw
    L = len(params)
    for i, (w, b, a) in enumerate(params):
        y = jax.lax.conv_general_dilated(
            x, w, window_strides=(1, 1), padding="SAME",
            dimension_numbers=("NCHW", "HWIO", "NCHW"),
            precision=jax.lax.Precision.HIGHEST)
        y = y + b[0][None, :, None, None]
        if i < L - 1:
            y = jnp.where(y >= 0, y, a[0][None, :, None, None] * y)
        x = y
    return x


if __name__ == "__main__":
    key = jax.random.PRNGKey(0)
    key, kx = jax.random.split(key)

    # SimpleCNN defaults: in_chan=2, out_chan=2, n_channels=8, depth=6
    N, C, H, W = 2, 2, 16, 16
    x = jax.random.normal(kx, (N, C, H, W), jnp.float32)       # NCHW like PyTorch
    params = init_params(key)

    out = jax.block_until_ready(jax.jit(simple_cnn_forward)(x, params))
    assert out.shape == (N, 2, H, W), out.shape

    ref = jax.block_until_ready(reference_forward(x, params))
    max_err = float(jnp.max(jnp.abs(out - ref)))
    assert jnp.allclose(out, ref, atol=1e-2, rtol=1e-2), max_err

    print("KERNEL_OK")
</pallas_src>

<mosaic_0001>
module attributes {stable_mosaic.version = 11 : i64} {
  func.func @_fused_cnn_kernel(%arg0: i32, %arg1: memref<1x8x384xf32, #tpu.memory_space<vmem>>, %arg2: memref<6x8x72xf32, #tpu.memory_space<vmem>>, %arg3: memref<6x8x1xf32, #tpu.memory_space<vmem>>, %arg4: memref<6x8x1xf32, #tpu.memory_space<vmem>>, %arg5: memref<1x384xf32, #tpu.memory_space<vmem>>, %arg6: memref<1x8x384xf32, #tpu.memory_space<vmem>>, %arg7: memref<72x384xf32, #tpu.memory_space<vmem>>) attributes {dimension_semantics = [#tpu.dimension_semantics<parallel>], iteration_bounds = array<i64: 2>, scalar_prefetch = 0 : i64, scratch_operands = 1 : i64, tpu.core_type = #tpu.core_type<tc>, window_params = [{transform_indices = @transform_0, window_bounds = array<i64: 1, 8, 384>}, {pipeline_mode = #tpu.pipeline_mode<synchronous>, transform_indices = @transform_1, window_bounds = array<i64: 6, 8, 72>}, {pipeline_mode = #tpu.pipeline_mode<synchronous>, transform_indices = @transform_2, window_bounds = array<i64: 6, 8, 1>}, {pipeline_mode = #tpu.pipeline_mode<synchronous>, transform_indices = @transform_3, window_bounds = array<i64: 6, 8, 1>}, {pipeline_mode = #tpu.pipeline_mode<synchronous>, transform_indices = @transform_4, window_bounds = array<i64: 1, 384>}, {transform_indices = @transform_5, window_bounds = array<i64: 1, 8, 384>}]} {
    %c0 = arith.constant 0 : index
    %c0_0 = arith.constant 0 : index
    %0 = vector.load %arg5[%c0, %c0_0] : memref<1x384xf32, #tpu.memory_space<vmem>>, vector<1x384xf32>
    %c0_1 = arith.constant 0 : index
    %c0_2 = arith.constant 0 : index
    %c0_3 = arith.constant 0 : index
    %1 = vector.load %arg1[%c0_1, %c0_2, %c0_3] : memref<1x8x384xf32, #tpu.memory_space<vmem>>, vector<1x8x384xf32>
    %2 = vector.shape_cast %1 : vector<1x8x384xf32> to vector<8x384xf32>
    %c19_i32 = arith.constant 19 : i32
    %3 = tpu.dynamic_rotate %2 by %c19_i32 dim 1 : vector<8x384xf32>, i32 -> vector<8x384xf32>
    %c0_4 = arith.constant 0 : index
    %c0_5 = arith.constant 0 : index
    %4 = vector.load %arg7[%c0_4, %c0_5] : memref<72x384xf32, #tpu.memory_space<vmem>>, vector<8x384xf32>
    tpu.vector_store %arg7[%c0_4, %c0_5], %3 {strides = array<i32>} : memref<72x384xf32, #tpu.memory_space<vmem>>, vector<8x384xf32>,
    %c18_i32 = arith.constant 18 : i32
    %5 = tpu.dynamic_rotate %2 by %c18_i32 dim 1 : vector<8x384xf32>, i32 -> vector<8x384xf32>
    %c8 = arith.constant 8 : index
    %c0_6 = arith.constant 0 : index
    %6 = vector.load %arg7[%c8, %c0_6] : memref<72x384xf32, #tpu.memory_space<vmem>>, vector<8x384xf32>
    tpu.vector_store %arg7[%c8, %c0_6], %5 {strides = array<i32>} : memref<72x384xf32, #tpu.memory_space<vmem>>, vector<8x384xf32>,
    %c17_i32 = arith.constant 17 : i32
    %7 = tpu.dynamic_rotate %2 by %c17_i32 dim 1 : vector<8x384xf32>, i32 -> vector<8x384xf32>
    %c16 = arith.constant 16 : index
    %c0_7 = arith.constant 0 : index
    %8 = vector.load %arg7[%c16, %c0_7] : memref<72x384xf32, #tpu.memory_space<vmem>>, vector<8x384xf32>
    tpu.vector_store %arg7[%c16, %c0_7], %7 {strides = array<i32>} : memref<72x384xf32, #tpu.memory_space<vmem>>, vector<8x384xf32>,
    %c1_i32 = arith.constant 1 : i32
    %9 = tpu.dynamic_rotate %2 by %c1_i32 dim 1 : vector<8x384xf32>, i32 -> vector<8x384xf32>
    %c24 = arith.constant 24 : index
    %c0_8 = arith.constant 0 : index
    %10 = vector.load %arg7[%c24, %c0_8] : memref<72x384xf32, #tpu.memory_space<vmem>>, vector<8x384xf32>
    tpu.vector_store %arg7[%c24, %c0_8], %9 {strides = array<i32>} : memref<72x384xf32, #tpu.memory_space<vmem>>, vector<8x384xf32>,
    %c32 = arith.constant 32 : index
    %c0_9 = arith.constant 0 : index
    %11 = vector.load %arg7[%c32, %c0_9] : memref<72x384xf32, #tpu.memory_space<vmem>>, vector<8x384xf32>
    tpu.vector_store %arg7[%c32, %c0_9], %2 {strides = array<i32>} : memref<72x384xf32, #tpu.memory_space<vmem>>, vector<8x384xf32>,
    %c383_i32 = arith.constant 383 : i32
    %12 = tpu.dynamic_rotate %2 by %c383_i32 dim 1 : vector<8x384xf32>, i32 -> vector<8x384xf32>
    %c40 = arith.constant 40 : index
    %c0_10 = arith.constant 0 : index
    %13 = vector.load %arg7[%c40, %c0_10] : memref<72x384xf32, #tpu.memory_space<vmem>>, vector<8x384xf32>
    tpu.vector_store %arg7[%c40, %c0_10], %12 {strides = array<i32>} : memref<72x384xf32, #tpu.memory_space<vmem>>, vector<8x384xf32>,
    %c367_i32 = arith.constant 367 : i32
    %14 = tpu.dynamic_rotate %2 by %c367_i32 dim 1 : vector<8x384xf32>, i32 -> vector<8x384xf32>
    %c48 = arith.constant 48 : index
    %c0_11 = arith.constant 0 : index
    %15 = vector.load %arg7[%c48, %c0_11] : memref<72x384xf32, #tpu.memory_space<vmem>>, vector<8x384xf32>
    tpu.vector_store %arg7[%c48, %c0_11], %14 {strides = array<i32>} : memref<72x384xf32, #tpu.memory_space<vmem>>, vector<8x384xf32>,
    %c366_i32 = arith.constant 366 : i32
    %16 = tpu.dynamic_rotate %2 by %c366_i32 dim 1 : vector<8x384xf32>, i32 -> vector<8x384xf32>
    %c56 = arith.constant 56 : index
    %c0_12 = arith.constant 0 : index
    %17 = vector.load %arg7[%c56, %c0_12] : memref<72x384xf32, #tpu.memory_space<vmem>>, vector<8x384xf32>
    tpu.vector_store %arg7[%c56, %c0_12], %16 {strides = array<i32>} : memref<72x384xf32, #tpu.memory_space<vmem>>, vector<8x384xf32>,
    %c365_i32 = arith.constant 365 : i32
    %18 = tpu.dynamic_rotate %2 by %c365_i32 dim 1 : vector<8x384xf32>, i32 -> vector<8x384xf32>
    %c64 = arith.constant 64 : index
    %c0_13 = arith.constant 0 : index
    %19 = vector.load %arg7[%c64, %c0_13] : memref<72x384xf32, #tpu.memory_space<vmem>>, vector<8x384xf32>
    tpu.vector_store %arg7[%c64, %c0_13], %18 {strides = array<i32>} : memref<72x384xf32, #tpu.memory_space<vmem>>, vector<8x384xf32>,
    %c0_14 = arith.constant 0 : index
    %c0_15 = arith.constant 0 : index
    %c0_16 = arith.constant 0 : index
    %20 = vector.load %arg2[%c0_14, %c0_15, %c0_16] : memref<6x8x72xf32, #tpu.memory_space<vmem>>, vector<1x8x72xf32>
    %21 = vector.shape_cast %20 : vector<1x8x72xf32> to vector<8x72xf32>
    %c0_17 = arith.constant 0 : index
    %c0_18 = arith.constant 0 : index
    %22 = vector.load %arg7[%c0_17, %c0_18] : memref<72x384xf32, #tpu.memory_space<vmem>>, vector<72x384xf32>
    %cst = arith.constant dense<0.000000e+00> : vector<8x384xf32>
    %23 = tpu.matmul %21, %22, %cst {dimension_numbers = #tpu.dot_dimension_numbers<[1], [0], [0], [1], [0, 0, 1, 1], [], []>} : vector<8x72xf32>, vector<72x384xf32>, vector<8x384xf32> -> vector<8x384xf32>
    %c0_19 = arith.constant 0 : index
    %c0_20 = arith.constant 0 : index
    %c0_21 = arith.constant 0 : index
    %24 = vector.load %arg3[%c0_19, %c0_20, %c0_21] : memref<6x8x1xf32, #tpu.memory_space<vmem>>, vector<1x8x1xf32>
    %25 = vector.shape_cast %24 : vector<1x8x1xf32> to vector<8x1xf32>
    %26 = vector.broadcast %25 : vector<8x1xf32> to vector<8x384xf32>
    %27 = arith.addf %23, %26 : vector<8x384xf32>
    %cst_22 = arith.constant 0.000000e+00 : f32
    %28 = vector.broadcast %cst_22 : f32 to vector<8x384xf32>
    %29 = arith.cmpf oge, %27, %28 : vector<8x384xf32>
    %c0_23 = arith.constant 0 : index
    %c0_24 = arith.constant 0 : index
    %c0_25 = arith.constant 0 : index
    %30 = vector.load %arg4[%c0_23, %c0_24, %c0_25] : memref<6x8x1xf32, #tpu.memory_space<vmem>>, vector<1x8x1xf32>
    %31 = vector.shape_cast %30 : vector<1x8x1xf32> to vector<8x1xf32>
    %32 = vector.broadcast %31 : vector<8x1xf32> to vector<8x384xf32>
    %33 = arith.mulf %32, %27 : vector<8x384xf32>
    %34 = arith.select %29, %27, %33 : vector<8x384xi1>, vector<8x384xf32>
    %35 = vector.broadcast %0 : vector<1x384xf32> to vector<8x384xf32>
    %36 = arith.mulf %34, %35 : vector<8x384xf32>
    %c19_i32_26 = arith.constant 19 : i32
    %37 = tpu.dynamic_rotate %36 by %c19_i32_26 dim 1 : vector<8x384xf32>, i32 -> vector<8x384xf32>
    %c0_27 = arith.constant 0 : index
    %c0_28 = arith.constant 0 : index
    %38 = vector.load %arg7[%c0_27, %c0_28] : memref<72x384xf32, #tpu.memory_space<vmem>>, vector<8x384xf32>
    tpu.vector_store %arg7[%c0_27, %c0_28], %37 {strides = array<i32>} : memref<72x384xf32, #tpu.memory_space<vmem>>, vector<8x384xf32>,
    %c18_i32_29 = arith.constant 18 : i32
    %39 = tpu.dynamic_rotate %36 by %c18_i32_29 dim 1 : vector<8x384xf32>, i32 -> vector<8x384xf32>
    %c8_30 = arith.constant 8 : index
    %c0_31 = arith.constant 0 : index
    %40 = vector.load %arg7[%c8_30, %c0_31] : memref<72x384xf32, #tpu.memory_space<vmem>>, vector<8x384xf32>
    tpu.vector_store %arg7[%c8_30, %c0_31], %39 {strides = array<i32>} : memref<72x384xf32, #tpu.memory_space<vmem>>, vector<8x384xf32>,
    %c17_i32_32 = arith.constant 17 : i32
    %41 = tpu.dynamic_rotate %36 by %c17_i32_32 dim 1 : vector<8x384xf32>, i32 -> vector<8x384xf32>
    %c16_33 = arith.constant 16 : index
    %c0_34 = arith.constant 0 : index
    %42 = vector.load %arg7[%c16_33, %c0_34] : memref<72x384xf32, #tpu.memory_space<vmem>>, vector<8x384xf32>
    tpu.vector_store %arg7[%c16_33, %c0_34], %41 {strides = array<i32>} : memref<72x384xf32, #tpu.memory_space<vmem>>, vector<8x384xf32>,
    %c1_i32_35 = arith.constant 1 : i32
    %43 = tpu.dynamic_rotate %36 by %c1_i32_35 dim 1 : vector<8x384xf32>, i32 -> vector<8x384xf32>
    %c24_36 = arith.constant 24 : index
    %c0_37 = arith.constant 0 : index
    %44 = vector.load %arg7[%c24_36, %c0_37] : memref<72x384xf32, #tpu.memory_space<vmem>>, vector<8x384xf32>
    tpu.vector_store %arg7[%c24_36, %c0_37], %43 {strides = array<i32>} : memref<72x384xf32, #tpu.memory_space<vmem>>, vector<8x384xf32>,
    %c32_38 = arith.constant 32 : index
    %c0_39 = arith.constant 0 : index
    %45 = vector.load %arg7[%c32_38, %c0_39] : memref<72x384xf32, #tpu.memory_space<vmem>>, vector<8x384xf32>
    tpu.vector_store %arg7[%c32_38, %c0_39], %36 {strides = array<i32>} : memref<72x384xf32, #tpu.memory_space<vmem>>, vector<8x384xf32>,
    %c383_i32_40 = arith.constant 383 : i32
    %46 = tpu.dynamic_rotate %36 by %c383_i32_40 dim 1 : vector<8x384xf32>, i32 -> vector<8x384xf32>
    %c40_41 = arith.constant 40 : index
    %c0_42 = arith.constant 0 : index
    %47 = vector.load %arg7[%c40_41, %c0_42] : memref<72x384xf32, #tpu.memory_space<vmem>>, vector<8x384xf32>
    tpu.vector_store %arg7[%c40_41, %c0_42], %46 {strides = array<i32>} : memref<72x384xf32, #tpu.memory_space<vmem>>, vector<8x384xf32>,
    %c367_i32_43 = arith.constant 367 : i32
    %48 = tpu.dynamic_rotate %36 by %c367_i32_43 dim 1 : vector<8x384xf32>, i32 -> vector<8x384xf32>
    %c48_44 = arith.constant 48 : index
    %c0_45 = arith.constant 0 : index
    %49 = vector.load %arg7[%c48_44, %c0_45] : memref<72x384xf32, #tpu.memory_space<vmem>>, vector<8x384xf32>
    tpu.vector_store %arg7[%c48_44, %c0_45], %48 {strides = array<i32>} : memref<72x384xf32, #tpu.memory_space<vmem>>, vector<8x384xf32>,
    %c366_i32_46 = arith.constant 366 : i32
    %50 = tpu.dynamic_rotate %36 by %c366_i32_46 dim 1 : vector<8x384xf32>, i32 -> vector<8x384xf32>
    %c56_47 = arith.constant 56 : index
    %c0_48 = arith.constant 0 : index
    %51 = vector.load %arg7[%c56_47, %c0_48] : memref<72x384xf32, #tpu.memory_space<vmem>>, vector<8x384xf32>
    tpu.vector_store %arg7[%c56_47, %c0_48], %50 {strides = array<i32>} : memref<72x384xf32, #tpu.memory_space<vmem>>, vector<8x384xf32>,
    %c365_i32_49 = arith.constant 365 : i32
    %52 = tpu.dynamic_rotate %36 by %c365_i32_49 dim 1 : vector<8x384xf32>, i32 -> vector<8x384xf32>
    %c64_50 = arith.constant 64 : index
    %c0_51 = arith.constant 0 : index
    %53 = vector.load %arg7[%c64_50, %c0_51] : memref<72x384xf32, #tpu.memory_space<vmem>>, vector<8x384xf32>
    tpu.vector_store %arg7[%c64_50, %c0_51], %52 {strides = array<i32>} : memref<72x384xf32, #tpu.memory_space<vmem>>, vector<8x384xf32>,
    %c1 = arith.constant 1 : index
    %c0_52 = arith.constant 0 : index
    %c0_53 = arith.constant 0 : index
    %54 = vector.load %arg2[%c1, %c0_52, %c0_53] : memref<6x8x72xf32, #tpu.memory_space<vmem>>, vector<1x8x72xf32>
    %55 = vector.shape_cast %54 : vector<1x8x72xf32> to vector<8x72xf32>
    %c0_54 = arith.constant 0 : index
    %c0_55 = arith.constant 0 : index
    %56 = vector.load %arg7[%c0_54, %c0_55] : memref<72x384xf32, #tpu.memory_space<vmem>>, vector<72x384xf32>
    %cst_56 = arith.constant dense<0.000000e+00> : vector<8x384xf32>
    %57 = tpu.matmul %55, %56, %cst_56 {dimension_numbers = #tpu.dot_dimension_numbers<[1], [0], [0], [1], [0, 0, 1, 1], [], []>} : vector<8x72xf32>, vector<72x384xf32>, vector<8x384xf32> -> vector<8x384xf32>
    %c1_57 = arith.constant 1 : index
    %c0_58 = arith.constant 0 : index
    %c0_59 = arith.constant 0 : index
    %58 = vector.load %arg3[%c1_57, %c0_58, %c0_59] : memref<6x8x1xf32, #tpu.memory_space<vmem>>, vector<1x8x1xf32>
    %59 = vector.shape_cast %58 : vector<1x8x1xf32> to vector<8x1xf32>
    %60 = vector.broadcast %59 : vector<8x1xf32> to vector<8x384xf32>
    %61 = arith.addf %57, %60 : vector<8x384xf32>
    %cst_60 = arith.constant 0.000000e+00 : f32
    %62 = vector.broadcast %cst_60 : f32 to vector<8x384xf32>
    %63 = arith.cmpf oge, %61, %62 : vector<8x384xf32>
    %c1_61 = arith.constant 1 : index
    %c0_62 = arith.constant 0 : index
    %c0_63 = arith.constant 0 : index
    %64 = vector.load %arg4[%c1_61, %c0_62, %c0_63] : memref<6x8x1xf32, #tpu.memory_space<vmem>>, vector<1x8x1xf32>
    %65 = vector.shape_cast %64 : vector<1x8x1xf32> to vector<8x1xf32>
    %66 = vector.broadcast %65 : vector<8x1xf32> to vector<8x384xf32>
    %67 = arith.mulf %66, %61 : vector<8x384xf32>
    %68 = arith.select %63, %61, %67 : vector<8x384xi1>, vector<8x384xf32>
    %69 = vector.broadcast %0 : vector<1x384xf32> to vector<8x384xf32>
    %70 = arith.mulf %68, %69 : vector<8x384xf32>
    %c19_i32_64 = arith.constant 19 : i32
    %71 = tpu.dynamic_rotate %70 by %c19_i32_64 dim 1 : vector<8x384xf32>, i32 -> vector<8x384xf32>
    %c0_65 = arith.constant 0 : index
    %c0_66 = arith.constant 0 : index
    %72 = vector.load %arg7[%c0_65, %c0_66] : memref<72x384xf32, #tpu.memory_space<vmem>>, vector<8x384xf32>
    tpu.vector_store %arg7[%c0_65, %c0_66], %71 {strides = array<i32>} : memref<72x384xf32, #tpu.memory_space<vmem>>, vector<8x384xf32>,
    %c18_i32_67 = arith.constant 18 : i32
    %73 = tpu.dynamic_rotate %70 by %c18_i32_67 dim 1 : vector<8x384xf32>, i32 -> vector<8x384xf32>
    %c8_68 = arith.constant 8 : index
    %c0_69 = arith.constant 0 : index
    %74 = vector.load %arg7[%c8_68, %c0_69] : memref<72x384xf32, #tpu.memory_space<vmem>>, vector<8x384xf32>
    tpu.vector_store %arg7[%c8_68, %c0_69], %73 {strides = array<i32>} : memref<72x384xf32, #tpu.memory_space<vmem>>, vector<8x384xf32>,
    %c17_i32_70 = arith.constant 17 : i32
    %75 = tpu.dynamic_rotate %70 by %c17_i32_70 dim 1 : vector<8x384xf32>, i32 -> vector<8x384xf32>
    %c16_71 = arith.constant 16 : index
    %c0_72 = arith.constant 0 : index
    %76 = vector.load %arg7[%c16_71, %c0_72] : memref<72x384xf32, #tpu.memory_space<vmem>>, vector<8x384xf32>
    tpu.vector_store %arg7[%c16_71, %c0_72], %75 {strides = array<i32>} : memref<72x384xf32, #tpu.memory_space<vmem>>, vector<8x384xf32>,
    %c1_i32_73 = arith.constant 1 : i32
    %77 = tpu.dynamic_rotate %70 by %c1_i32_73 dim 1 : vector<8x384xf32>, i32 -> vector<8x384xf32>
    %c24_74 = arith.constant 24 : index
    %c0_75 = arith.constant 0 : index
    %78 = vector.load %arg7[%c24_74, %c0_75] : memref<72x384xf32, #tpu.memory_space<vmem>>, vector<8x384xf32>
    tpu.vector_store %arg7[%c24_74, %c0_75], %77 {strides = array<i32>} : memref<72x384xf32, #tpu.memory_space<vmem>>, vector<8x384xf32>,
    %c32_76 = arith.constant 32 : index
    %c0_77 = arith.constant 0 : index
    %79 = vector.load %arg7[%c32_76, %c0_77] : memref<72x384xf32, #tpu.memory_space<vmem>>, vector<8x384xf32>
    tpu.vector_store %arg7[%c32_76, %c0_77], %70 {strides = array<i32>} : memref<72x384xf32, #tpu.memory_space<vmem>>, vector<8x384xf32>,
    %c383_i32_78 = arith.constant 383 : i32
    %80 = tpu.dynamic_rotate %70 by %c383_i32_78 dim 1 : vector<8x384xf32>, i32 -> vector<8x384xf32>
    %c40_79 = arith.constant 40 : index
    %c0_80 = arith.constant 0 : index
    %81 = vector.load %arg7[%c40_79, %c0_80] : memref<72x384xf32, #tpu.memory_space<vmem>>, vector<8x384xf32>
    tpu.vector_store %arg7[%c40_79, %c0_80], %80 {strides = array<i32>} : memref<72x384xf32, #tpu.memory_space<vmem>>, vector<8x384xf32>,
    %c367_i32_81 = arith.constant 367 : i32
    %82 = tpu.dynamic_rotate %70 by %c367_i32_81 dim 1 : vector<8x384xf32>, i32 -> vector<8x384xf32>
    %c48_82 = arith.constant 48 : index
    %c0_83 = arith.constant 0 : index
    %83 = vector.load %arg7[%c48_82, %c0_83] : memref<72x384xf32, #tpu.memory_space<vmem>>, vector<8x384xf32>
    tpu.vector_store %arg7[%c48_82, %c0_83], %82 {strides = array<i32>} : memref<72x384xf32, #tpu.memory_space<vmem>>, vector<8x384xf32>,
    %c366_i32_84 = arith.constant 366 : i32
    %84 = tpu.dynamic_rotate %70 by %c366_i32_84 dim 1 : vector<8x384xf32>, i32 -> vector<8x384xf32>
    %c56_85 = arith.constant 56 : index
    %c0_86 = arith.constant 0 : index
    %85 = vector.load %arg7[%c56_85, %c0_86] : memref<72x384xf32, #tpu.memory_space<vmem>>, vector<8x384xf32>
    tpu.vector_store %arg7[%c56_85, %c0_86], %84 {strides = array<i32>} : memref<72x384xf32, #tpu.memory_space<vmem>>, vector<8x384xf32>,
    %c365_i32_87 = arith.constant 365 : i32
    %86 = tpu.dynamic_rotate %70 by %c365_i32_87 dim 1 : vector<8x384xf32>, i32 -> vector<8x384xf32>
    %c64_88 = arith.constant 64 : index
    %c0_89 = arith.constant 0 : index
    %87 = vector.load %arg7[%c64_88, %c0_89] : memref<72x384xf32, #tpu.memory_space<vmem>>, vector<8x384xf32>
    tpu.vector_store %arg7[%c64_88, %c0_89], %86 {strides = array<i32>} : memref<72x384xf32, #tpu.memory_space<vmem>>, vector<8x384xf32>,
    %c2 = arith.constant 2 : index
    %c0_90 = arith.constant 0 : index
    %c0_91 = arith.constant 0 : index
    %88 = vector.load %arg2[%c2, %c0_90, %c0_91] : memref<6x8x72xf32, #tpu.memory_space<vmem>>, vector<1x8x72xf32>
    %89 = vector.shape_cast %88 : vector<1x8x72xf32> to vector<8x72xf32>
    %c0_92 = arith.constant 0 : index
    %c0_93 = arith.constant 0 : index
    %90 = vector.load %arg7[%c0_92, %c0_93] : memref<72x384xf32, #tpu.memory_space<vmem>>, vector<72x384xf32>
    %cst_94 = arith.constant dense<0.000000e+00> : vector<8x384xf32>
    %91 = tpu.matmul %89, %90, %cst_94 {dimension_numbers = #tpu.dot_dimension_numbers<[1], [0], [0], [1], [0, 0, 1, 1], [], []>} : vector<8x72xf32>, vector<72x384xf32>, vector<8x384xf32> -> vector<8x384xf32>
    %c2_95 = arith.constant 2 : index
    %c0_96 = arith.constant 0 : index
    %c0_97 = arith.constant 0 : index
    %92 = vector.load %arg3[%c2_95, %c0_96, %c0_97] : memref<6x8x1xf32, #tpu.memory_space<vmem>>, vector<1x8x1xf32>
    %93 = vector.shape_cast %92 : vector<1x8x1xf32> to vector<8x1xf32>
    %94 = vector.broadcast %93 : vector<8x1xf32> to vector<8x384xf32>
    %95 = arith.addf %91, %94 : vector<8x384xf32>
    %cst_98 = arith.constant 0.000000e+00 : f32
    %96 = vector.broadcast %cst_98 : f32 to vector<8x384xf32>
    %97 = arith.cmpf oge, %95, %96 : vector<8x384xf32>
    %c2_99 = arith.constant 2 : index
    %c0_100 = arith.constant 0 : index
    %c0_101 = arith.constant 0 : index
    %98 = vector.load %arg4[%c2_99, %c0_100, %c0_101] : memref<6x8x1xf32, #tpu.memory_space<vmem>>, vector<1x8x1xf32>
    %99 = vector.shape_cast %98 : vector<1x8x1xf32> to vector<8x1xf32>
    %100 = vector.broadcast %99 : vector<8x1xf32> to vector<8x384xf32>
    %101 = arith.mulf %100, %95 : vector<8x384xf32>
    %102 = arith.select %97, %95, %101 : vector<8x384xi1>, vector<8x384xf32>
    %103 = vector.broadcast %0 : vector<1x384xf32> to vector<8x384xf32>
    %104 = arith.mulf %102, %103 : vector<8x384xf32>
    %c19_i32_102 = arith.constant 19 : i32
    %105 = tpu.dynamic_rotate %104 by %c19_i32_102 dim 1 : vector<8x384xf32>, i32 -> vector<8x384xf32>
    %c0_103 = arith.constant 0 : index
    %c0_104 = arith.constant 0 : index
    %106 = vector.load %arg7[%c0_103, %c0_104] : memref<72x384xf32, #tpu.memory_space<vmem>>, vector<8x384xf32>
    tpu.vector_store %arg7[%c0_103, %c0_104], %105 {strides = array<i32>} : memref<72x384xf32, #tpu.memory_space<vmem>>, vector<8x384xf32>,
    %c18_i32_105 = arith.constant 18 : i32
    %107 = tpu.dynamic_rotate %104 by %c18_i32_105 dim 1 : vector<8x384xf32>, i32 -> vector<8x384xf32>
    %c8_106 = arith.constant 8 : index
    %c0_107 = arith.constant 0 : index
    %108 = vector.load %arg7[%c8_106, %c0_107] : memref<72x384xf32, #tpu.memory_space<vmem>>, vector<8x384xf32>
    tpu.vector_store %arg7[%c8_106, %c0_107], %107 {strides = array<i32>} : memref<72x384xf32, #tpu.memory_space<vmem>>, vector<8x384xf32>,
    %c17_i32_108 = arith.constant 17 : i32
    %109 = tpu.dynamic_rotate %104 by %c17_i32_108 dim 1 : vector<8x384xf32>, i32 -> vector<8x384xf32>
    %c16_109 = arith.constant 16 : index
    %c0_110 = arith.constant 0 : index
    %110 = vector.load %arg7[%c16_109, %c0_110] : memref<72x384xf32, #tpu.memory_space<vmem>>, vector<8x384xf32>
    tpu.vector_store %arg7[%c16_109, %c0_110], %109 {strides = array<i32>} : memref<72x384xf32, #tpu.memory_space<vmem>>, vector<8x384xf32>,
    %c1_i32_111 = arith.constant 1 : i32
    %111 = tpu.dynamic_rotate %104 by %c1_i32_111 dim 1 : vector<8x384xf32>, i32 -> vector<8x384xf32>
    %c24_112 = arith.constant 24 : index
    %c0_113 = arith.constant 0 : index
    %112 = vector.load %arg7[%c24_112, %c0_113] : memref<72x384xf32, #tpu.memory_space<vmem>>, vector<8x384xf32>
    tpu.vector_store %arg7[%c24_112, %c0_113], %111 {strides = array<i32>} : memref<72x384xf32, #tpu.memory_space<vmem>>, vector<8x384xf32>,
    %c32_114 = arith.constant 32 : index
    %c0_115 = arith.constant 0 : index
    %113 = vector.load %arg7[%c32_114, %c0_115] : memref<72x384xf32, #tpu.memory_space<vmem>>, vector<8x384xf32>
    tpu.vector_store %arg7[%c32_114, %c0_115], %104 {strides = array<i32>} : memref<72x384xf32, #tpu.memory_space<vmem>>, vector<8x384xf32>,
    %c383_i32_116 = arith.constant 383 : i32
    %114 = tpu.dynamic_rotate %104 by %c383_i32_116 dim 1 : vector<8x384xf32>, i32 -> vector<8x384xf32>
    %c40_117 = arith.constant 40 : index
    %c0_118 = arith.constant 0 : index
    %115 = vector.load %arg7[%c40_117, %c0_118] : memref<72x384xf32, #tpu.memory_space<vmem>>, vector<8x384xf32>
    tpu.vector_store %arg7[%c40_117, %c0_118], %114 {strides = array<i32>} : memref<72x384xf32, #tpu.memory_space<vmem>>, vector<8x384xf32>,
    %c367_i32_119 = arith.constant 367 : i32
    %116 = tpu.dynamic_rotate %104 by %c367_i32_119 dim 1 : vector<8x384xf32>, i32 -> vector<8x384xf32>
    %c48_120 = arith.constant 48 : index
    %c0_121 = arith.constant 0 : index
    %117 = vector.load %arg7[%c48_120, %c0_121] : memref<72x384xf32, #tpu.memory_space<vmem>>, vector<8x384xf32>
    tpu.vector_store %arg7[%c48_120, %c0_121], %116 {strides = array<i32>} : memref<72x384xf32, #tpu.memory_space<vmem>>, vector<8x384xf32>,
    %c366_i32_122 = arith.constant 366 : i32
    %118 = tpu.dynamic_rotate %104 by %c366_i32_122 dim 1 : vector<8x384xf32>, i32 -> vector<8x384xf32>
    %c56_123 = arith.constant 56 : index
    %c0_124 = arith.constant 0 : index
    %119 = vector.load %arg7[%c56_123, %c0_124] : memref<72x384xf32, #tpu.memory_space<vmem>>, vector<8x384xf32>
    tpu.vector_store %arg7[%c56_123, %c0_124], %118 {strides = array<i32>} : memref<72x384xf32, #tpu.memory_space<vmem>>, vector<8x384xf32>,
    %c365_i32_125 = arith.constant 365 : i32
    %120 = tpu.dynamic_rotate %104 by %c365_i32_125 dim 1 : vector<8x384xf32>, i32 -> vector<8x384xf32>
    %c64_126 = arith.constant 64 : index
    %c0_127 = arith.constant 0 : index
    %121 = vector.load %arg7[%c64_126, %c0_127] : memref<72x384xf32, #tpu.memory_space<vmem>>, vector<8x384xf32>
    tpu.vector_store %arg7[%c64_126, %c0_127], %120 {strides = array<i32>} : memref<72x384xf32, #tpu.memory_space<vmem>>, vector<8x384xf32>,
    %c3 = arith.constant 3 : index
    %c0_128 = arith.constant 0 : index
    %c0_129 = arith.constant 0 : index
    %122 = vector.load %arg2[%c3, %c0_128, %c0_129] : memref<6x8x72xf32, #tpu.memory_space<vmem>>, vector<1x8x72xf32>
    %123 = vector.shape_cast %122 : vector<1x8x72xf32> to vector<8x72xf32>
    %c0_130 = arith.constant 0 : index
    %c0_131 = arith.constant 0 : index
    %124 = vector.load %arg7[%c0_130, %c0_131] : memref<72x384xf32, #tpu.memory_space<vmem>>, vector<72x384xf32>
    %cst_132 = arith.constant dense<0.000000e+00> : vector<8x384xf32>
    %125 = tpu.matmul %123, %124, %cst_132 {dimension_numbers = #tpu.dot_dimension_numbers<[1], [0], [0], [1], [0, 0, 1, 1], [], []>} : vector<8x72xf32>, vector<72x384xf32>, vector<8x384xf32> -> vector<8x384xf32>
    %c3_133 = arith.constant 3 : index
    %c0_134 = arith.constant 0 : index
    %c0_135 = arith.constant 0 : index
    %126 = vector.load %arg3[%c3_133, %c0_134, %c0_135] : memref<6x8x1xf32, #tpu.memory_space<vmem>>, vector<1x8x1xf32>
    %127 = vector.shape_cast %126 : vector<1x8x1xf32> to vector<8x1xf32>
    %128 = vector.broadcast %127 : vector<8x1xf32> to vector<8x384xf32>
    %129 = arith.addf %125, %128 : vector<8x384xf32>
    %cst_136 = arith.constant 0.000000e+00 : f32
    %130 = vector.broadcast %cst_136 : f32 to vector<8x384xf32>
    %131 = arith.cmpf oge, %129, %130 : vector<8x384xf32>
    %c3_137 = arith.constant 3 : index
    %c0_138 = arith.constant 0 : index
    %c0_139 = arith.constant 0 : index
    %132 = vector.load %arg4[%c3_137, %c0_138, %c0_139] : memref<6x8x1xf32, #tpu.memory_space<vmem>>, vector<1x8x1xf32>
    %133 = vector.shape_cast %132 : vector<1x8x1xf32> to vector<8x1xf32>
    %134 = vector.broadcast %133 : vector<8x1xf32> to vector<8x384xf32>
    %135 = arith.mulf %134, %129 : vector<8x384xf32>
    %136 = arith.select %131, %129, %135 : vector<8x384xi1>, vector<8x384xf32>
    %137 = vector.broadcast %0 : vector<1x384xf32> to vector<8x384xf32>
    %138 = arith.mulf %136, %137 : vector<8x384xf32>
    %c19_i32_140 = arith.constant 19 : i32
    %139 = tpu.dynamic_rotate %138 by %c19_i32_140 dim 1 : vector<8x384xf32>, i32 -> vector<8x384xf32>
    %c0_141 = arith.constant 0 : index
    %c0_142 = arith.constant 0 : index
    %140 = vector.load %arg7[%c0_141, %c0_142] : memref<72x384xf32, #tpu.memory_space<vmem>>, vector<8x384xf32>
    tpu.vector_store %arg7[%c0_141, %c0_142], %139 {strides = array<i32>} : memref<72x384xf32, #tpu.memory_space<vmem>>, vector<8x384xf32>,
    %c18_i32_143 = arith.constant 18 : i32
    %141 = tpu.dynamic_rotate %138 by %c18_i32_143 dim 1 : vector<8x384xf32>, i32 -> vector<8x384xf32>
    %c8_144 = arith.constant 8 : index
    %c0_145 = arith.constant 0 : index
    %142 = vector.load %arg7[%c8_144, %c0_145] : memref<72x384xf32, #tpu.memory_space<vmem>>, vector<8x384xf32>
    tpu.vector_store %arg7[%c8_144, %c0_145], %141 {strides = array<i32>} : memref<72x384xf32, #tpu.memory_space<vmem>>, vector<8x384xf32>,
    %c17_i32_146 = arith.constant 17 : i32
    %143 = tpu.dynamic_rotate %138 by %c17_i32_146 dim 1 : vector<8x384xf32>, i32 -> vector<8x384xf32>
    %c16_147 = arith.constant 16 : index
    %c0_148 = arith.constant 0 : index
    %144 = vector.load %arg7[%c16_147, %c0_148] : memref<72x384xf32, #tpu.memory_space<vmem>>, vector<8x384xf32>
    tpu.vector_store %arg7[%c16_147, %c0_148], %143 {strides = array<i32>} : memref<72x384xf32, #tpu.memory_space<vmem>>, vector<8x384xf32>,
    %c1_i32_149 = arith.constant 1 : i32
    %145 = tpu.dynamic_rotate %138 by %c1_i32_149 dim 1 : vector<8x384xf32>, i32 -> vector<8x384xf32>
    %c24_150 = arith.constant 24 : index
    %c0_151 = arith.constant 0 : index
    %146 = vector.load %arg7[%c24_150, %c0_151] : memref<72x384xf32, #tpu.memory_space<vmem>>, vector<8x384xf32>
    tpu.vector_store %arg7[%c24_150, %c0_151], %145 {strides = array<i32>} : memref<72x384xf32, #tpu.memory_space<vmem>>, vector<8x384xf32>,
    %c32_152 = arith.constant 32 : index
    %c0_153 = arith.constant 0 : index
    %147 = vector.load %arg7[%c32_152, %c0_153] : memref<72x384xf32, #tpu.memory_space<vmem>>, vector<8x384xf32>
    tpu.vector_store %arg7[%c32_152, %c0_153], %138 {strides = array<i32>} : memref<72x384xf32, #tpu.memory_space<vmem>>, vector<8x384xf32>,
    %c383_i32_154 = arith.constant 383 : i32
    %148 = tpu.dynamic_rotate %138 by %c383_i32_154 dim 1 : vector<8x384xf32>, i32 -> vector<8x384xf32>
    %c40_155 = arith.constant 40 : index
    %c0_156 = arith.constant 0 : index
    %149 = vector.load %arg7[%c40_155, %c0_156] : memref<72x384xf32, #tpu.memory_space<vmem>>, vector<8x384xf32>
    tpu.vector_store %arg7[%c40_155, %c0_156], %148 {strides = array<i32>} : memref<72x384xf32, #tpu.memory_space<vmem>>, vector<8x384xf32>,
    %c367_i32_157 = arith.constant 367 : i32
    %150 = tpu.dynamic_rotate %138 by %c367_i32_157 dim 1 : vector<8x384xf32>, i32 -> vector<8x384xf32>
    %c48_158 = arith.constant 48 : index
    %c0_159 = arith.constant 0 : index
    %151 = vector.load %arg7[%c48_158, %c0_159] : memref<72x384xf32, #tpu.memory_space<vmem>>, vector<8x384xf32>
    tpu.vector_store %arg7[%c48_158, %c0_159], %150 {strides = array<i32>} : memref<72x384xf32, #tpu.memory_space<vmem>>, vector<8x384xf32>,
    %c366_i32_160 = arith.constant 366 : i32
    %152 = tpu.dynamic_rotate %138 by %c366_i32_160 dim 1 : vector<8x384xf32>, i32 -> vector<8x384xf32>
    %c56_161 = arith.constant 56 : index
    %c0_162 = arith.constant 0 : index
    %153 = vector.load %arg7[%c56_161, %c0_162] : memref<72x384xf32, #tpu.memory_space<vmem>>, vector<8x384xf32>
    tpu.vector_store %arg7[%c56_161, %c0_162], %152 {strides = array<i32>} : memref<72x384xf32, #tpu.memory_space<vmem>>, vector<8x384xf32>,
    %c365_i32_163 = arith.constant 365 : i32
    %154 = tpu.dynamic_rotate %138 by %c365_i32_163 dim 1 : vector<8x384xf32>, i32 -> vector<8x384xf32>
    %c64_164 = arith.constant 64 : index
    %c0_165 = arith.constant 0 : index
    %155 = vector.load %arg7[%c64_164, %c0_165] : memref<72x384xf32, #tpu.memory_space<vmem>>, vector<8x384xf32>
    tpu.vector_store %arg7[%c64_164, %c0_165], %154 {strides = array<i32>} : memref<72x384xf32, #tpu.memory_space<vmem>>, vector<8x384xf32>,
    %c4 = arith.constant 4 : index
    %c0_166 = arith.constant 0 : index
    %c0_167 = arith.constant 0 : index
    %156 = vector.load %arg2[%c4, %c0_166, %c0_167] : memref<6x8x72xf32, #tpu.memory_space<vmem>>, vector<1x8x72xf32>
    %157 = vector.shape_cast %156 : vector<1x8x72xf32> to vector<8x72xf32>
    %c0_168 = arith.constant 0 : index
    %c0_169 = arith.constant 0 : index
    %158 = vector.load %arg7[%c0_168, %c0_169] : memref<72x384xf32, #tpu.memory_space<vmem>>, vector<72x384xf32>
    %cst_170 = arith.constant dense<0.000000e+00> : vector<8x384xf32>
    %159 = tpu.matmul %157, %158, %cst_170 {dimension_numbers = #tpu.dot_dimension_numbers<[1], [0], [0], [1], [0, 0, 1, 1], [], []>} : vector<8x72xf32>, vector<72x384xf32>, vector<8x384xf32> -> vector<8x384xf32>
    %c4_171 = arith.constant 4 : index
    %c0_172 = arith.constant 0 : index
    %c0_173 = arith.constant 0 : index
    %160 = vector.load %arg3[%c4_171, %c0_172, %c0_173] : memref<6x8x1xf32, #tpu.memory_space<vmem>>, vector<1x8x1xf32>
    %161 = vector.shape_cast %160 : vector<1x8x1xf32> to vector<8x1xf32>
    %162 = vector.broadcast %161 : vector<8x1xf32> to vector<8x384xf32>
    %163 = arith.addf %159, %162 : vector<8x384xf32>
    %cst_174 = arith.constant 0.000000e+00 : f32
    %164 = vector.broadcast %cst_174 : f32 to vector<8x384xf32>
    %165 = arith.cmpf oge, %163, %164 : vector<8x384xf32>
    %c4_175 = arith.constant 4 : index
    %c0_176 = arith.constant 0 : index
    %c0_177 = arith.constant 0 : index
    %166 = vector.load %arg4[%c4_175, %c0_176, %c0_177] : memref<6x8x1xf32, #tpu.memory_space<vmem>>, vector<1x8x1xf32>
    %167 = vector.shape_cast %166 : vector<1x8x1xf32> to vector<8x1xf32>
    %168 = vector.broadcast %167 : vector<8x1xf32> to vector<8x384xf32>
    %169 = arith.mulf %168, %163 : vector<8x384xf32>
    %170 = arith.select %165, %163, %169 : vector<8x384xi1>, vector<8x384xf32>
    %171 = vector.broadcast %0 : vector<1x384xf32> to vector<8x384xf32>
    %172 = arith.mulf %170, %171 : vector<8x384xf32>
    %c19_i32_178 = arith.constant 19 : i32
    %173 = tpu.dynamic_rotate %172 by %c19_i32_178 dim 1 : vector<8x384xf32>, i32 -> vector<8x384xf32>
    %c0_179 = arith.constant 0 : index
    %c0_180 = arith.constant 0 : index
    %174 = vector.load %arg7[%c0_179, %c0_180] : memref<72x384xf32, #tpu.memory_space<vmem>>, vector<8x384xf32>
    tpu.vector_store %arg7[%c0_179, %c0_180], %173 {strides = array<i32>} : memref<72x384xf32, #tpu.memory_space<vmem>>, vector<8x384xf32>,
    %c18_i32_181 = arith.constant 18 : i32
    %175 = tpu.dynamic_rotate %172 by %c18_i32_181 dim 1 : vector<8x384xf32>, i32 -> vector<8x384xf32>
    %c8_182 = arith.constant 8 : index
    %c0_183 = arith.constant 0 : index
    %176 = vector.load %arg7[%c8_182, %c0_183] : memref<72x384xf32, #tpu.memory_space<vmem>>, vector<8x384xf32>
    tpu.vector_store %arg7[%c8_182, %c0_183], %175 {strides = array<i32>} : memref<72x384xf32, #tpu.memory_space<vmem>>, vector<8x384xf32>,
    %c17_i32_184 = arith.constant 17 : i32
    %177 = tpu.dynamic_rotate %172 by %c17_i32_184 dim 1 : vector<8x384xf32>, i32 -> vector<8x384xf32>
    %c16_185 = arith.constant 16 : index
    %c0_186 = arith.constant 0 : index
    %178 = vector.load %arg7[%c16_185, %c0_186] : memref<72x384xf32, #tpu.memory_space<vmem>>, vector<8x384xf32>
    tpu.vector_store %arg7[%c16_185, %c0_186], %177 {strides = array<i32>} : memref<72x384xf32, #tpu.memory_space<vmem>>, vector<8x384xf32>,
    %c1_i32_187 = arith.constant 1 : i32
    %179 = tpu.dynamic_rotate %172 by %c1_i32_187 dim 1 : vector<8x384xf32>, i32 -> vector<8x384xf32>
    %c24_188 = arith.constant 24 : index
    %c0_189 = arith.constant 0 : index
    %180 = vector.load %arg7[%c24_188, %c0_189] : memref<72x384xf32, #tpu.memory_space<vmem>>, vector<8x384xf32>
    tpu.vector_store %arg7[%c24_188, %c0_189], %179 {strides = array<i32>} : memref<72x384xf32, #tpu.memory_space<vmem>>, vector<8x384xf32>,
    %c32_190 = arith.constant 32 : index
    %c0_191 = arith.constant 0 : index
    %181 = vector.load %arg7[%c32_190, %c0_191] : memref<72x384xf32, #tpu.memory_space<vmem>>, vector<8x384xf32>
    tpu.vector_store %arg7[%c32_190, %c0_191], %172 {strides = array<i32>} : memref<72x384xf32, #tpu.memory_space<vmem>>, vector<8x384xf32>,
    %c383_i32_192 = arith.constant 383 : i32
    %182 = tpu.dynamic_rotate %172 by %c383_i32_192 dim 1 : vector<8x384xf32>, i32 -> vector<8x384xf32>
    %c40_193 = arith.constant 40 : index
    %c0_194 = arith.constant 0 : index
    %183 = vector.load %arg7[%c40_193, %c0_194] : memref<72x384xf32, #tpu.memory_space<vmem>>, vector<8x384xf32>
    tpu.vector_store %arg7[%c40_193, %c0_194], %182 {strides = array<i32>} : memref<72x384xf32, #tpu.memory_space<vmem>>, vector<8x384xf32>,
    %c367_i32_195 = arith.constant 367 : i32
    %184 = tpu.dynamic_rotate %172 by %c367_i32_195 dim 1 : vector<8x384xf32>, i32 -> vector<8x384xf32>
    %c48_196 = arith.constant 48 : index
    %c0_197 = arith.constant 0 : index
    %185 = vector.load %arg7[%c48_196, %c0_197] : memref<72x384xf32, #tpu.memory_space<vmem>>, vector<8x384xf32>
    tpu.vector_store %arg7[%c48_196, %c0_197], %184 {strides = array<i32>} : memref<72x384xf32, #tpu.memory_space<vmem>>, vector<8x384xf32>,
    %c366_i32_198 = arith.constant 366 : i32
    %186 = tpu.dynamic_rotate %172 by %c366_i32_198 dim 1 : vector<8x384xf32>, i32 -> vector<8x384xf32>
    %c56_199 = arith.constant 56 : index
    %c0_200 = arith.constant 0 : index
    %187 = vector.load %arg7[%c56_199, %c0_200] : memref<72x384xf32, #tpu.memory_space<vmem>>, vector<8x384xf32>
    tpu.vector_store %arg7[%c56_199, %c0_200], %186 {strides = array<i32>} : memref<72x384xf32, #tpu.memory_space<vmem>>, vector<8x384xf32>,
    %c365_i32_201 = arith.constant 365 : i32
    %188 = tpu.dynamic_rotate %172 by %c365_i32_201 dim 1 : vector<8x384xf32>, i32 -> vector<8x384xf32>
    %c64_202 = arith.constant 64 : index
    %c0_203 = arith.constant 0 : index
    %189 = vector.load %arg7[%c64_202, %c0_203] : memref<72x384xf32, #tpu.memory_space<vmem>>, vector<8x384xf32>
    tpu.vector_store %arg7[%c64_202, %c0_203], %188 {strides = array<i32>} : memref<72x384xf32, #tpu.memory_space<vmem>>, vector<8x384xf32>,
    %c5 = arith.constant 5 : index
    %c0_204 = arith.constant 0 : index
    %c0_205 = arith.constant 0 : index
    %190 = vector.load %arg2[%c5, %c0_204, %c0_205] : memref<6x8x72xf32, #tpu.memory_space<vmem>>, vector<1x8x72xf32>
    %191 = vector.shape_cast %190 : vector<1x8x72xf32> to vector<8x72xf32>
    %c0_206 = arith.constant 0 : index
    %c0_207 = arith.constant 0 : index
    %192 = vector.load %arg7[%c0_206, %c0_207] : memref<72x384xf32, #tpu.memory_space<vmem>>, vector<72x384xf32>
    %cst_208 = arith.constant dense<0.000000e+00> : vector<8x384xf32>
    %193 = tpu.matmul %191, %192, %cst_208 {dimension_numbers = #tpu.dot_dimension_numbers<[1], [0], [0], [1], [0, 0, 1, 1], [], []>} : vector<8x72xf32>, vector<72x384xf32>, vector<8x384xf32> -> vector<8x384xf32>
    %c5_209 = arith.constant 5 : index
    %c0_210 = arith.constant 0 : index
    %c0_211 = arith.constant 0 : index
    %194 = vector.load %arg3[%c5_209, %c0_210, %c0_211] : memref<6x8x1xf32, #tpu.memory_space<vmem>>, vector<1x8x1xf32>
    %195 = vector.shape_cast %194 : vector<1x8x1xf32> to vector<8x1xf32>
    %196 = vector.broadcast %195 : vector<8x1xf32> to vector<8x384xf32>
    %197 = arith.addf %193, %196 : vector<8x384xf32>
    %cst_212 = arith.constant 0.000000e+00 : f32
    %198 = vector.broadcast %cst_212 : f32 to vector<8x384xf32>
    %199 = arith.cmpf oge, %197, %198 : vector<8x384xf32>
    %c5_213 = arith.constant 5 : index
    %c0_214 = arith.constant 0 : index
    %c0_215 = arith.constant 0 : index
    %200 = vector.load %arg4[%c5_213, %c0_214, %c0_215] : memref<6x8x1xf32, #tpu.memory_space<vmem>>, vector<1x8x1xf32>
    %201 = vector.shape_cast %200 : vector<1x8x1xf32> to vector<8x1xf32>
    %202 = vector.broadcast %201 : vector<8x1xf32> to vector<8x384xf32>
    %203 = arith.mulf %202, %197 : vector<8x384xf32>
    %204 = arith.select %199, %197, %203 : vector<8x384xi1>, vector<8x384xf32>
    %205 = vector.broadcast %0 : vector<1x384xf32> to vector<8x384xf32>
    %206 = arith.mulf %204, %205 : vector<8x384xf32>
    %c0_216 = arith.constant 0 : index
    %c0_217 = arith.constant 0 : index
    %c0_218 = arith.constant 0 : index
    %207 = vector.load %arg6[%c0_216, %c0_217, %c0_218] : memref<1x8x384xf32, #tpu.memory_space<vmem>>, vector<1x8x384xf32>
    %208 = vector.shape_cast %207 : vector<1x8x384xf32> to vector<8x384xf32>
    %209 = vector.shape_cast %206 : vector<8x384xf32> to vector<1x8x384xf32>
    tpu.vector_store %arg6[%c0_216, %c0_217, %c0_218], %209 {strides = array<i32>} : memref<1x8x384xf32, #tpu.memory_space<vmem>>, vector<1x8x384xf32>,
    return
  }
  func.func @transform_0(%arg0: i32) -> (i32, i32, i32) {
    %c0_i32 = arith.constant 0 : i32
    %c0_i32_0 = arith.constant 0 : i32
    %c0_i32_1 = arith.constant 0 : i32
    return %arg0, %c0_i32, %c0_i32_0 : i32, i32, i32
  }
  func.func @transform_1(%arg0: i32) -> (i32, i32, i32) {
    %c0_i32 = arith.constant 0 : i32
    %c0_i32_0 = arith.constant 0 : i32
    %c0_i32_1 = arith.constant 0 : i32
    %c0_i32_2 = arith.constant 0 : i32
    return %c0_i32, %c0_i32_0, %c0_i32_1 : i32, i32, i32
  }
  func.func @transform_2(%arg0: i32) -> (i32, i32, i32) {
    %c0_i32 = arith.constant 0 : i32
    %c0_i32_0 = arith.constant 0 : i32
    %c0_i32_1 = arith.constant 0 : i32
    %c0_i32_2 = arith.constant 0 : i32
    return %c0_i32, %c0_i32_0, %c0_i32_1 : i32, i32, i32
  }
  func.func @transform_3(%arg0: i32) -> (i32, i32, i32) {
    %c0_i32 = arith.constant 0 : i32
    %c0_i32_0 = arith.constant 0 : i32
    %c0_i32_1 = arith.constant 0 : i32
    %c0_i32_2 = arith.constant 0 : i32
    return %c0_i32, %c0_i32_0, %c0_i32_1 : i32, i32, i32
  }
  func.func @transform_4(%arg0: i32) -> (i32, i32) {
    %c0_i32 = arith.constant 0 : i32
    %c0_i32_0 = arith.constant 0 : i32
    %c0_i32_1 = arith.constant 0 : i32
    return %c0_i32, %c0_i32_0 : i32, i32
  }
  func.func @transform_5(%arg0: i32) -> (i32, i32, i32) {
    %c0_i32 = arith.constant 0 : i32
    %c0_i32_0 = arith.constant 0 : i32
    %c0_i32_1 = arith.constant 0 : i32
    return %arg0, %c0_i32, %c0_i32_0 : i32, i32, i32
  }
}

</mosaic_0001>

<bundles_post_ra>
// kernel: simple_cnn_forward.1
= control target key start
LH: loop header
LB: loop body
LE: loop exit
PB: predicated region body
PF: predicated region fallthrough
CT: control target
= control target key end

     0   :  { %s2772_s18 = smov 0   ;;  %s3477_s0 = inlined_call_operand.vmem [shape: f32[2,8,384], index: 0, kind: input, shape index: {}]   ;;  %s3478_s1 = inlined_call_operand.vmem [shape: f32[6,8,72], index: 1, kind: input, shape index: {}]   ;;  %s3479_s2 = inlined_call_operand.vmem [shape: f32[6,8,1], index: 2, kind: input, shape index: {}]   ;;  %s3480_s3 = inlined_call_operand.vmem [shape: f32[6,8,1], index: 3, kind: input, shape index: {}]   ;;  %s3481_s4 = inlined_call_operand.vmem [shape: f32[1,384], index: 4, kind: input, shape index: {}]   ;;  %s3482_s5 = inlined_call_operand.vmem [shape: f32[2,8,384], index: 5, kind: output, shape index: {}]  }
   0x1 LB: > { %s2099_s19 = sadd.s32 4294967295, %s2728_s18   ;;  %p2103_p0 = scmp.ge.s32.totalorder %s2728_s18, 1  ;;  %s2728_s18 = sphi %s2772_s18, %s15_s18  }
   0x2   : > { %p187_p1 = scmp.lt.s32.totalorder %s2728_s18, 3 }
   0x4   : > { %p188_p2 = pnand %p2103_p0, %p187_p1 }
   0x5   : > { %p215_p3 = scmp.lt.s32.totalorder (!%p188_p2), %s2099_s19, 1  ;;  %v2730_v0 = vmov (!%p188_p2), 0.0|0.0   ;;  %s2731_s24 = smov (!%p188_p2), 19   ;;  %v2737_v6 = vmov (!%p188_p2), 0.0   ;;  %vm2739_vm0 = vmmov (!%p188_p2), 0   ;;  %v2740_v7 = vmov (!%p188_p2), 0  }
   0x6   : > { %191 = sbr.rel (%p188_p2) target bundleno = 2233 (0x8b9), region = 40  ;;  %2337 = vmatprep.subr.bf16.mxu1 (!%p188_p2), %v2730_v0  ;;  %s2732_s25 = smov (!%p188_p2), 18   ;;  %440 = vmatprep.mubr.f32.mxu0 (!%p188_p2), %v2737_v6  ;;  %v366_v8 = vld [vmem:[%s3479_s2] sm:$0xff] (!%p188_p2)  ;;  %v235_v10 = vlaneseq (!%p188_p2)  ;;  %vm372_vm9 = vcmask (!%p188_p2), 588800  }
   0x7   : > { %s2733_s26 = smov (!%p188_p2), 1   ;;  %s2734_s27 = smov (!%p188_p2), 17   ;;  %2213 = vmatprep.mubr.msk.f32.mxu1 (!%p188_p2), %vm2739_vm0, %v2737_v6  ;;  %2546 = vset.pattern.permute.xlu0 (!%p188_p2), %v2740_v7  ;;  %v520_v9 = vld [vmem:[%s3480_s3] sm:$0xff] (!%p188_p2) }
   0x8   : > { %s2735_s28 = smov (!%p188_p2), 127   ;;  %s2736_s29 = smov (!%p188_p2), 110   ;;  %2545 = vset.pattern.permute.xlu1 (!%p188_p2), %v2740_v7  ;;  %v2836_v12 = vand.u32 (!%p188_p2), 127, %v235_v10 }
   0x9   : > { %s2738_s30 = smov (!%p188_p2), 111   ;;  %s2741_s6 = smov (!%p188_p2), 109  }
   0xa   : > { %vm237_vm1 = vcmp.lt.s32.totalorder (!%p188_p2), %v2836_v12, 19  ;;  %vm250_vm2 = vcmp.lt.s32.totalorder (!%p188_p2), %v2836_v12, 18  ;;  %vm276_vm3 = vcmp.lt.s32.totalorder (!%p188_p2), %v2836_v12, 1  ;;  %vm263_vm4 = vcmp.lt.s32.totalorder (!%p188_p2), %v2836_v12, 17 }
   0xb   : > { %vm292_vm5 = vcmp.lt.s32.totalorder (!%p188_p2), %v2836_v12, 127  ;;  %vm318_vm6 = vcmp.lt.s32.totalorder (!%p188_p2), %v2836_v12, 110  ;;  %vm305_vm7 = vcmp.lt.s32.totalorder (!%p188_p2), %v2836_v12, 111  ;;  %vm331_vm8 = vcmp.lt.s32.totalorder (!%p188_p2), %v2836_v12, 109 }
   0xd   : > { %s3484_s19 = smov (!%p215_p3, %s2099_s19), 1 }
   0xe   : > { %s2489_s20 = smul.u32 24, %s3484_s19 }
  0x10   : > { %s219_s23 = scalar_lea.vmem %s3477_s0, %s2489_s20  ;;  %s224_s11 = scalar_lea.vmem %s3482_s5, %s2489_s20 }
  0x11   : > { %v2789_v1 = vld [vmem:[%s219_s23 + $0x10] sm:$0xff]  ;;  %v2791_v2 = vld [vmem:[%s219_s23] sm:$0xff]  ;;  %v2793_v3 = vld [vmem:[%s219_s23 + $0x8] sm:$0xff] }
  0x12   : > { %233 = vrot.lane.b32.xlu1 %v2789_v1, %s2731_s24  ;;  %v2510_v4 = vpack.i.bf16 %v2793_v3, %v2791_v2  ;;  %v2530_v5 = vpack.i.bf16 %v2789_v1, %v2793_v3 }
  0x14   : > { %2511 = vrot.lane.b32.xlu0 %v2510_v4, %s2731_s24 }
  0x16   : > { %248 = vrot.lane.b32.xlu1 %v2789_v1, %s2732_s25 }
  0x18   : > { %2516 = vrot.lane.b32.xlu0 %v2510_v4, %s2732_s25 }
  0x1a   : > { %2526 = vrot.lane.b32.xlu1 %v2510_v4, %s2733_s26 }
  0x1c   : > { %2521 = vrot.lane.b32.xlu0 %v2510_v4, %s2734_s27 }
  0x1e   : > { %274 = vrot.lane.b32.xlu1 %v2789_v1, %s2733_s26 }
  0x20   : > { %261 = vrot.lane.b32.xlu0 %v2789_v1, %s2734_s27 }
  0x22   : > { %286 = vrot.lane.b32.xlu1 %v2791_v2, %s2735_s28 }
  0x24   : > { %2531 = vrot.lane.b32.xlu0 %v2530_v5, %s2735_s28 }
  0x26   : > { %2541 = vrot.lane.b32.xlu1 %v2530_v5, %s2736_s29 }
  0x28   : > { %2536 = vrot.lane.b32.xlu0 %v2530_v5, %s2738_s30 }
  0x2a   : > { %312 = vrot.lane.b32.xlu1 %v2791_v2, %s2736_s29 }
  0x2c   : > { %299 = vrot.lane.b32.xlu0 %v2791_v2, %s2738_s30 }
  0x2e   : > { %329 = vrot.lane.b32.xlu1 %v2789_v1, %s2741_s6 }
  0x30   : > { %327 = vrot.lane.b32.xlu0 %v2793_v3, %s2741_s6 }
  0x32   : > { %369 = vperm.xlu1 %2545, %v366_v8  }
  0x34   : > { %325 = vrot.lane.b32.xlu0 %v2791_v2, %s2741_s6 }
  0x38   : > { %523 = vperm.xlu0 %2546, %v520_v9  }
  0x84   : > { %v234_v11 = vpop.permute.xlu1 %233 }
  0x86   : > { %v2512_v13 = vpop.permute.xlu0 %2511 }
  0x87   : > { %v2514_v14 = vunpack.i.h.bf16 %v2512_v13  ;;  %v2513_v15 = vunpack.i.l.bf16 %v2512_v13 }
  0x88   : > { %v249_v16 = vpop.permute.xlu1 %248 }
  0x89   : > { %v239_v21 = vsel %vm237_vm1, %v2513_v15, %v2514_v14  ;;  %v238_v22 = vsel %vm237_vm1, %v2514_v14, %v234_v11  ;;  %v240_v30 = vsel %vm237_vm1, %v234_v11, %v2513_v15 }
  0x8a   : > { %v2517_v17 = vpop.permute.xlu0 %2516 }
  0x8b   : > { %v2519_v18 = vunpack.i.h.bf16 %v2517_v17  ;;  %v2518_v19 = vunpack.i.l.bf16 %v2517_v17  ;;  %v338_v17 = vld [vmem:[%s3478_s1] sm:$0xff] }
  0x8c   : > { %v2527_v20 = vpop.permute.xlu1 %2526 }
  0x8d   : > { %v2529_v23 = vunpack.i.h.bf16 %v2527_v20  ;;  %v2528_v24 = vunpack.i.l.bf16 %v2527_v20  ;;  %v252_v25 = vsel %vm250_vm2, %v2518_v19, %v2519_v18  ;;  %v251_v26 = vsel %vm250_vm2, %v2519_v18, %v249_v16 }
  0x8e   : > { %v2522_v27 = vpop.permute.xlu0 %2521  ;;  %v2321_v28 = vpack.c.bf16 %v252_v25, %v239_v21  ;;  %v2338_v29 = vpack.c.bf16 %v251_v26, %v238_v22  ;;  %v253_v31 = vsel %vm250_vm2, %v249_v16, %v2518_v19  ;;  %v534_v20 = vshrl.u32 %v235_v10, 7 }
  0x8f   : > { %v2524_v32 = vunpack.i.h.bf16 %v2522_v27  ;;  %v2523_v33 = vunpack.i.l.bf16 %v2522_v27  ;;  %v2323_v34 = vpack.c.bf16 %v253_v31, %v240_v30  ;;  %v278_v35 = vsel %vm276_vm3, %v2528_v24, %v2529_v23 }
  0x90   : > { %2322 = vmatprep.subr.bf16.mxu0 %v2321_v28  ;;  %2339 = vmatpush3.bf16.msra.mxu1 %v2338_v29  ;;  %v275_v36 = vpop.permute.xlu1 %274  ;;  %v543_v22 = vsub.s32 2, %v534_v20 }
  0x91   : > { %2324 = vmatpush1.bf16.msra.mxu0 %v2323_v34  ;;  %v277_v37 = vsel %vm276_vm3, %v2529_v23, %v275_v36  ;;  %v279_v38 = vsel %vm276_vm3, %v275_v36, %v2528_v24  ;;  %v265_v39 = vsel %vm263_vm4, %v2523_v33, %v2524_v32  ;;  %2340 = vmatprep.subr.bf16.mxu1 %v2730_v0  ;;  %v225_v23 = vld [vmem:[%s3481_s4] sm:$0x7] }
  0x92   : > { %v262_v40 = vpop.permute.xlu0 %261  ;;  %v2325_v41 = vpack.c.bf16 %v278_v35, %v265_v39  ;;  %v2914_v34 = vrot.slane %v225_v23, %v543_v22 }
  0x93   : > { %v264_v42 = vsel %vm263_vm4, %v2524_v32, %v262_v40  ;;  %v266_v43 = vsel %vm263_vm4, %v262_v40, %v2523_v33  ;;  %v535_v32 = vsub.s32 0, %v534_v20  ;;  %v539_v33 = vsub.s32 1, %v534_v20 }
  0x94   : > { %2326 = vmatprep.subr.bf16.mxu0 %v2325_v41  ;;  %v287_v44 = vpop.permute.xlu1 %286  ;;  %v2327_v45 = vpack.c.bf16 %v279_v38, %v266_v43  ;;  %v2341_v46 = vpack.c.bf16 %v277_v37, %v264_v42 }
  0x95   : > { %v2916_v38 = vrot.slane %v225_v23, %v535_v32  ;;  %v2918_v39 = vrot.slane %v225_v23, %v539_v33 }
  0x96   : > { %v2532_v47 = vpop.permute.xlu0 %2531  ;;  %2328 = vmatpush1.bf16.msra.mxu0 %v2327_v45  ;;  %2342 = vmatpush3.bf16.msra.mxu1 %v2341_v46 }
  0x97   : > { %v2534_v48 = vunpack.i.h.bf16 %v2532_v47  ;;  %v2533_v49 = vunpack.i.l.bf16 %v2532_v47  ;;  %2343 = vmatprep.subr.bf16.mxu1 %v2730_v0  ;;  %v2112_v47 = vld [vmem:[%s3480_s3 + $0x8] sm:$0xff] }
  0x98   : > { %v2542_v50 = vpop.permute.xlu1 %2541 }
  0x99   : > { %v2544_v51 = vunpack.i.h.bf16 %v2542_v50  ;;  %v2543_v52 = vunpack.i.l.bf16 %v2542_v50  ;;  %v293_v53 = vsel %vm292_vm5, %v2533_v49, %v2534_v48  ;;  %v295_v54 = vsel %vm292_vm5, %v2534_v48, %v287_v44  ;;  %v2109_v48 = vld [vmem:[%s3479_s2 + $0x8] sm:$0xff] }
  0x9a   : > { %v2537_v55 = vpop.permute.xlu0 %2536  ;;  %v2329_v56 = vpack.c.bf16 %v293_v53, %v2793_v3  ;;  %v2344_v57 = vpack.c.bf16 %v295_v54, %v2789_v1  ;;  %v294_v58 = vsel %vm292_vm5, %v287_v44, %v2533_v49 }
  0x9b   : > { %v2539_v59 = vunpack.i.h.bf16 %v2537_v55  ;;  %v2538_v60 = vunpack.i.l.bf16 %v2537_v55  ;;  %v2331_v61 = vpack.c.bf16 %v294_v58, %v2791_v2  ;;  %v319_v62 = vsel %vm318_vm6, %v2543_v52, %v2544_v51 }
  0x9c   : > { %2330 = vmatprep.subr.bf16.mxu0 %v2329_v56  ;;  %2345 = vmatpush3.bf16.msra.mxu1 %v2344_v57  ;;  %v313_v63 = vpop.permute.xlu1 %312 }
  0x9d   : > { %2332 = vmatpush1.bf16.msra.mxu0 %v2331_v61  ;;  %v320_v3 = vsel %vm318_vm6, %v313_v63, %v2543_v52  ;;  %v321_v1 = vsel %vm318_vm6, %v2544_v51, %v313_v63  ;;  %v306_v4 = vsel %vm305_vm7, %v2538_v60, %v2539_v59  ;;  %2346 = vmatprep.subr.bf16.mxu1 %v2730_v0 }
  0x9e   : > { %v300_v5 = vpop.permute.xlu0 %299  ;;  %v2333_v2 = vpack.c.bf16 %v319_v62, %v306_v4 }
  0x9f   : > { %v307_v7 = vsel %vm305_vm7, %v300_v5, %v2538_v60  ;;  %v308_v8 = vsel %vm305_vm7, %v2539_v59, %v300_v5 }
  0xa0   : > { %2334 = vmatprep.subr.bf16.mxu0 %v2333_v2  ;;  %v330_v9 = vpop.permute.xlu1 %329  ;;  %v2335_v11 = vpack.c.bf16 %v320_v3, %v307_v7  ;;  %v2347_v13 = vpack.c.bf16 %v321_v1, %v308_v8 }
  0xa2   : > { %v328_v14 = vpop.permute.xlu0 %327  ;;  %2336 = vmatpush1.bf16.msra.mxu0 %v2335_v11  ;;  %2348 = vmatpush3.bf16.msra.mxu1 %v2347_v13 }
  0xa3   : > { %v332_v15 = vsel %vm331_vm8, %v328_v14, %v330_v9  ;;  %2211 = vmatprep.subr.mxu1 %v2737_v6 }
  0xa4   : > { %392 = vmatprep.subr.mxu0 %v332_v15 }
  0xa6   : > { %v326_v16 = vpop.permute.xlu0 %325 }
  0xa7   : > { %v333_v18 = vsel %vm331_vm8, %v326_v16, %v328_v14  ;;  %v334_v19 = vsel %vm331_vm8, %v330_v9, %v326_v16 }
  0xa8   : > { %393 = vmatpush1.msra.mxu0 %v333_v18  ;;  %2212 = vmatpush3.msra.mxu1 %v334_v19 }
  0xa9   : > { %2106 = vmatmul.mubr.msk.f32.vlgmr.msra.gmra.mrb[0].mxu0 %vm372_vm9, %v338_v17  ;;  %2214 = vmatmul.mubr.msk.f32.vlgmr.msra.gmra.mrb[0].mxu1 %vm372_vm9, %v338_v17 }
  0xaa   : > { %2365 = vmatprep.subr.bf16.mxu1 %v2730_v0  ;;  %753 = vmatprep.mubr.f32.mxu0 %v2737_v6 }
  0xab   : > { %2234 = vmatprep.mubr.msk.f32.mxu1 %vm2739_vm0, %v2737_v6 }
  0xb1   : > { %v370_v21 = vpop.permute.xlu1 %369 }
  0xb7   : > { %v524_v24 = vpop.permute.xlu0 %523 }
 0x17c   : > { %v442_v25 = vpop.f32.mrb[0].mxu0  ;;  %v513_v26 = vpop.f32.mrb[0].mxu1 }
 0x17d   : > { %v443_v27 = vadd.f32 %v442_v25, %v370_v21  ;;  %v514_v28 = vadd.f32 %v513_v26, %v370_v21  ;;  %v444_v29 = vpop.f32.mrb[1].mxu0  ;;  %v2215_v30 = vpop.f32.mrb[1].mxu1 }
 0x17e   : > { %v445_v31 = vadd.f32 %v444_v29, %v370_v21 }
 0x17f   : > { %vm519_vm10 = vcmp.ge.f32.partialorder %v514_v28, 0.0  ;;  %v526_v10 = vmul.f32 %v524_v24, %v443_v27  ;;  %v528_v35 = vmul.f32 %v524_v24, %v514_v28  ;;  %vm517_vm11 = vcmp.ge.f32.partialorder %v443_v27, 0.0 }
 0x180   : > { %vm518_vm12 = vcmp.ge.f32.partialorder %v445_v31, 0.0  ;;  %v527_v36 = vmul.f32 %v524_v24, %v445_v31 }
 0x181   : > { %v531_v37 = vsel %vm519_vm10, %v514_v28, %v528_v35  ;;  %v529_v41 = vsel %vm517_vm11, %v443_v27, %v526_v10 }
 0x182   : > { %v2921_v40 = vmul.f32 %v2914_v34, %v531_v37  ;;  %v530_v42 = vsel %vm518_vm12, %v445_v31, %v527_v36  ;;  %v2928_v43 = vmul.f32 %v2916_v38, %v529_v41 }
 0x183   : > { %v2931_v44 = vmul.f32 %v2918_v39, %v530_v42 }
 0x184   : > { %567 = vrot.lane.b32.xlu1 %v2921_v40, %s2732_s25  ;;  %555 = vrot.lane.b32.xlu0 %v2921_v40, %s2731_s24 }
 0x185   : > { %v2557_v45 = vpack.i.bf16 %v2931_v44, %v2928_v43  ;;  %v2567_v46 = vpack.i.bf16 %v2921_v40, %v2931_v44 }
 0x188   : > { %591 = vrot.lane.b32.xlu1 %v2921_v40, %s2733_s26  ;;  %579 = vrot.lane.b32.xlu0 %v2921_v40, %s2734_s27 }
 0x18c   : > { %2558 = vrot.lane.b32.xlu0 %v2557_v45, %s2734_s27  ;;  %2548 = vrot.lane.b32.xlu1 %v2557_v45, %s2731_s24 }
 0x190   : > { %614 = vrot.lane.b32.xlu0 %v2928_v43, %s2738_s30  ;;  %2553 = vrot.lane.b32.xlu1 %v2557_v45, %s2732_s25 }
 0x194   : > { %2568 = vrot.lane.b32.xlu0 %v2567_v46, %s2735_s28  ;;  %2563 = vrot.lane.b32.xlu1 %v2557_v45, %s2733_s26 }
 0x198   : > { %2573 = vrot.lane.b32.xlu0 %v2567_v46, %s2738_s30  ;;  %602 = vrot.lane.b32.xlu1 %v2928_v43, %s2735_s28 }
 0x19c   : > { %640 = vrot.lane.b32.xlu0 %v2931_v44, %s2741_s6  ;;  %2578 = vrot.lane.b32.xlu1 %v2567_v46, %s2736_s29 }
 0x1a0   : > { %638 = vrot.lane.b32.xlu0 %v2928_v43, %s2741_s6  ;;  %626 = vrot.lane.b32.xlu1 %v2928_v43, %s2736_s29 }
 0x1a4   : > { %837 = vperm.xlu0 %2546, %v2112_v47   ;;  %642 = vrot.lane.b32.xlu1 %v2921_v40, %s2741_s6 }
 0x1a8   : > { %683 = vperm.xlu1 %2545, %v2109_v48  }
 0x1f6   : > { %v568_v49 = vpop.permute.xlu1 %567  ;;  %v556_v50 = vpop.permute.xlu0 %555 }
 0x1fa   : > { %v592_v51 = vpop.permute.xlu1 %591  ;;  %v580_v52 = vpop.permute.xlu0 %579 }
 0x1fe   : > { %v2559_v53 = vpop.permute.xlu0 %2558  ;;  %v2549_v54 = vpop.permute.xlu1 %2548 }
 0x1ff   : > { %v2551_v55 = vunpack.i.h.bf16 %v2549_v54  ;;  %v2550_v56 = vunpack.i.l.bf16 %v2549_v54  ;;  %v2561_v61 = vunpack.i.h.bf16 %v2559_v53  ;;  %v2560_v62 = vunpack.i.l.bf16 %v2559_v53 }
 0x201   : > { %v557_v63 = vsel %vm237_vm1, %v2551_v55, %v556_v50  ;;  %v559_v3 = vsel %vm237_vm1, %v556_v50, %v2550_v56  ;;  %v558_v5 = vsel %vm237_vm1, %v2550_v56, %v2551_v55  ;;  %v581_v18 = vsel %vm263_vm4, %v2561_v61, %v580_v52  ;;  %v2108_v56 = vld [vmem:[%s3478_s1 + $0x8] sm:$0xff] }
 0x202   : > { %v615_v57 = vpop.permute.xlu0 %614  ;;  %v2554_v58 = vpop.permute.xlu1 %2553  ;;  %v583_v19 = vsel %vm263_vm4, %v580_v52, %v2560_v62  ;;  %v582_v20 = vsel %vm263_vm4, %v2560_v62, %v2561_v61 }
 0x203   : > { %v2556_v59 = vunpack.i.h.bf16 %v2554_v58  ;;  %v2555_v60 = vunpack.i.l.bf16 %v2554_v58 }
 0x205   : > { %v569_v1 = vsel %vm250_vm2, %v2556_v59, %v568_v49  ;;  %v571_v4 = vsel %vm250_vm2, %v568_v49, %v2555_v60  ;;  %v570_v2 = vsel %vm250_vm2, %v2555_v60, %v2556_v59 }
 0x206   : > { %v2351_v7 = vpack.c.bf16 %v571_v4, %v559_v3  ;;  %v2366_v8 = vpack.c.bf16 %v569_v1, %v557_v63  ;;  %v2569_v9 = vpop.permute.xlu0 %2568  ;;  %v2564_v11 = vpop.permute.xlu1 %2563  ;;  %v2349_v13 = vpack.c.bf16 %v570_v2, %v558_v5 }
 0x207   : > { %v2571_v14 = vunpack.i.h.bf16 %v2569_v9  ;;  %v2570_v15 = vunpack.i.l.bf16 %v2569_v9  ;;  %v2566_v16 = vunpack.i.h.bf16 %v2564_v11  ;;  %v2565_v17 = vunpack.i.l.bf16 %v2564_v11 }
 0x208   : > { %2350 = vmatprep.subr.bf16.mxu0 %v2349_v13  ;;  %2367 = vmatpush3.bf16.msra.mxu1 %v2366_v8 }
 0x209   : > { %v593_v21 = vsel %vm276_vm3, %v2566_v16, %v592_v51  ;;  %v595_v22 = vsel %vm276_vm3, %v592_v51, %v2565_v17  ;;  %2352 = vmatpush1.bf16.msra.mxu0 %v2351_v7  ;;  %2368 = vmatprep.subr.bf16.mxu1 %v2730_v0  ;;  %v594_v23 = vsel %vm276_vm3, %v2565_v17, %v2566_v16 }
 0x20a   : > { %v2369_v24 = vpack.c.bf16 %v593_v21, %v581_v18  ;;  %v2355_v25 = vpack.c.bf16 %v595_v22, %v583_v19  ;;  %v2574_v26 = vpop.permute.xlu0 %2573  ;;  %v603_v27 = vpop.permute.xlu1 %602  ;;  %v2353_v28 = vpack.c.bf16 %v594_v23, %v582_v20  ;;  %v608_v29 = vsel %vm292_vm5, %v2570_v15, %v2571_v14  ;;  %v2114_v19 = vld [vmem:[%s3479_s2 + $0x10] sm:$0xff] }
 0x20b   : > { %v610_v30 = vsel %vm292_vm5, %v2571_v14, %v603_v27  ;;  %v609_v31 = vsel %vm292_vm5, %v603_v27, %v2570_v15  ;;  %v2357_v32 = vpack.c.bf16 %v608_v29, %v2931_v44  ;;  %v2576_v33 = vunpack.i.h.bf16 %v2574_v26  ;;  %v2117_v20 = vld [vmem:[%s3480_s3 + $0x10] sm:$0xff] }
 0x20c   : > { %2354 = vmatprep.subr.bf16.mxu0 %v2353_v28  ;;  %2370 = vmatpush3.bf16.msra.mxu1 %v2369_v24  ;;  %v2575_v10 = vunpack.i.l.bf16 %v2574_v26  ;;  %v2372_v35 = vpack.c.bf16 %v610_v30, %v2921_v40  ;;  %v2359_v37 = vpack.c.bf16 %v609_v31, %v2928_v43 }
 0x20d   : > { %2356 = vmatpush1.bf16.msra.mxu0 %v2355_v25  ;;  %2371 = vmatprep.subr.bf16.mxu1 %v2730_v0  ;;  %v622_v43 = vsel %vm305_vm7, %v2576_v33, %v615_v57 }
 0x20e   : > { %v2579_v36 = vpop.permute.xlu1 %2578  ;;  %2358 = vmatprep.subr.bf16.mxu0 %v2357_v32  ;;  %v641_v45 = vpop.permute.xlu0 %640  ;;  %v620_v46 = vsel %vm305_vm7, %v2575_v10, %v2576_v33  ;;  %v621_v40 = vsel %vm305_vm7, %v615_v57, %v2575_v10 }
 0x20f   : > { %v2581_v41 = vunpack.i.h.bf16 %v2579_v36  ;;  %v2580_v42 = vunpack.i.l.bf16 %v2579_v36 }
 0x210   : > { %2373 = vmatpush3.bf16.msra.mxu1 %v2372_v35 }
 0x211   : > { %2360 = vmatpush1.bf16.msra.mxu0 %v2359_v37  ;;  %v632_v44 = vsel %vm318_vm6, %v2580_v42, %v2581_v41  ;;  %2374 = vmatprep.subr.bf16.mxu1 %v2730_v0 }
 0x212   : > { %v627_v47 = vpop.permute.xlu1 %626  ;;  %v2361_v48 = vpack.c.bf16 %v632_v44, %v620_v46  ;;  %v639_v53 = vpop.permute.xlu0 %638 }
 0x213   : > { %v633_v49 = vsel %vm318_vm6, %v627_v47, %v2580_v42  ;;  %v634_v50 = vsel %vm318_vm6, %v2581_v41, %v627_v47  ;;  %v645_v57 = vsel %vm331_vm8, %v639_v53, %v641_v45 }
 0x214   : > { %v2363_v51 = vpack.c.bf16 %v633_v49, %v621_v40  ;;  %v2375_v52 = vpack.c.bf16 %v634_v50, %v622_v43  ;;  %2362 = vmatprep.subr.bf16.mxu0 %v2361_v48 }
 0x216   : > { %v643_v54 = vpop.permute.xlu1 %642  ;;  %2364 = vmatpush1.bf16.msra.mxu0 %v2363_v51  ;;  %2376 = vmatpush3.bf16.msra.mxu1 %v2375_v52 }
 0x217   : > { %v644_v55 = vsel %vm331_vm8, %v641_v45, %v643_v54  ;;  %2232 = vmatprep.subr.mxu1 %v2737_v6  ;;  %v646_v58 = vsel %vm331_vm8, %v643_v54, %v639_v53 }
 0x218   : > { %705 = vmatprep.subr.mxu0 %v644_v55 }
 0x21a   : > { %706 = vmatpush1.msra.mxu0 %v645_v57  ;;  %2233 = vmatpush3.msra.mxu1 %v646_v58 }
 0x21b   : > { %2110 = vmatmul.mubr.msk.f32.vlgmr.msra.gmra.mrb[2].mxu0 %vm372_vm9, %v2108_v56  ;;  %2235 = vmatmul.mubr.msk.f32.vlgmr.msra.gmra.mrb[2].mxu1 %vm372_vm9, %v2108_v56 }
 0x21c   : > { %2393 = vmatprep.subr.bf16.mxu1 %v2730_v0  ;;  %2255 = vmatprep.mubr.msk.f32.mxu1 %vm2739_vm0, %v2737_v6 }
 0x21d   : > { %1051 = vmatprep.mubr.f32.mxu0 %v2737_v6 }
 0x223   : > { %v838_v4 = vpop.permute.xlu0 %837 }
 0x227   : > { %v684_v59 = vpop.permute.xlu1 %683 }
 0x2ee   : > { %v755_v60 = vpop.f32.mrb[2].mxu0  ;;  %v826_v61 = vpop.f32.mrb[2].mxu1 }
 0x2ef   : > { %v756_v62 = vadd.f32 %v755_v60, %v684_v59  ;;  %v827_v63 = vadd.f32 %v826_v61, %v684_v59  ;;  %v757_v3 = vpop.f32.mrb[3].mxu0  ;;  %v2236_v1 = vpop.f32.mrb[3].mxu1 }
 0x2f0   : > { %v758_v5 = vadd.f32 %v757_v3, %v684_v59 }
 0x2f1   : > { %v840_v2 = vmul.f32 %v838_v4, %v756_v62  ;;  %vm832_vm13 = vcmp.ge.f32.partialorder %v827_v63, 0.0  ;;  %v842_v7 = vmul.f32 %v838_v4, %v827_v63  ;;  %vm830_vm14 = vcmp.ge.f32.partialorder %v756_v62, 0.0 }
 0x2f2   : > { %vm831_vm15 = vcmp.ge.f32.partialorder %v758_v5, 0.0  ;;  %v841_v8 = vmul.f32 %v838_v4, %v758_v5 }
 0x2f3   : > { %v845_v9 = vsel %vm832_vm13, %v827_v63, %v842_v7  ;;  %v843_v13 = vsel %vm830_vm14, %v756_v62, %v840_v2 }
 0x2f4   : > { %v3031_v11 = vmul.f32 %v845_v9, %v2914_v34  ;;  %v844_v14 = vsel %vm831_vm15, %v758_v5, %v841_v8  ;;  %v3038_v15 = vmul.f32 %v843_v13, %v2916_v38 }
 0x2f5   : > { %v3041_v16 = vmul.f32 %v844_v14, %v2918_v39 }
 0x2f6   : > { %865 = vrot.lane.b32.xlu0 %v3031_v11, %s2732_s25  ;;  %853 = vrot.lane.b32.xlu1 %v3031_v11, %s2731_s24 }
 0x2f7   : > { %v2587_v17 = vpack.i.bf16 %v3041_v16, %v3038_v15  ;;  %v2612_v18 = vpack.i.bf16 %v3031_v11, %v3041_v16 }
 0x2fa   : > { %889 = vrot.lane.b32.xlu0 %v3031_v11, %s2733_s26  ;;  %877 = vrot.lane.b32.xlu1 %v3031_v11, %s2734_s27 }
 0x2fe   : > { %2588 = vrot.lane.b32.xlu0 %v2587_v17, %s2732_s25  ;;  %2583 = vrot.lane.b32.xlu1 %v2587_v17, %s2731_s24 }
 0x302   : > { %2598 = vrot.lane.b32.xlu0 %v2587_v17, %s2733_s26  ;;  %2593 = vrot.lane.b32.xlu1 %v2587_v17, %s2734_s27 }
 0x306   : > { %900 = vrot.lane.b32.xlu0 %v3038_v15, %s2735_s28  ;;  %912 = vrot.lane.b32.xlu1 %v3038_v15, %s2738_s30 }
 0x30a   : > { %2613 = vrot.lane.b32.xlu0 %v2612_v18, %s2736_s29  ;;  %2603 = vrot.lane.b32.xlu1 %v2612_v18, %s2735_s28 }
 0x30e   : > { %924 = vrot.lane.b32.xlu0 %v3038_v15, %s2736_s29  ;;  %2608 = vrot.lane.b32.xlu1 %v2612_v18, %s2738_s30 }
 0x312   : > { %940 = vrot.lane.b32.xlu0 %v3031_v11, %s2741_s6  ;;  %938 = vrot.lane.b32.xlu1 %v3041_v16, %s2741_s6 }
 0x316   : > { %981 = vperm.xlu0 %2546, %v2114_v19   ;;  %936 = vrot.lane.b32.xlu1 %v3038_v15, %s2741_s6 }
 0x31a   : > { %1135 = vperm.xlu1 %2545, %v2117_v20  }
 0x368   : > { %v866_v21 = vpop.permute.xlu0 %865  ;;  %v854_v22 = vpop.permute.xlu1 %853 }
 0x36c   : > { %v890_v23 = vpop.permute.xlu0 %889  ;;  %v878_v24 = vpop.permute.xlu1 %877 }
 0x370   : > { %v2589_v25 = vpop.permute.xlu0 %2588  ;;  %v2584_v26 = vpop.permute.xlu1 %2583 }
 0x371   : > { %v2591_v27 = vunpack.i.h.bf16 %v2589_v25  ;;  %v2590_v28 = vunpack.i.l.bf16 %v2589_v25  ;;  %v2586_v29 = vunpack.i.h.bf16 %v2584_v26  ;;  %v2585_v30 = vunpack.i.l.bf16 %v2584_v26 }
 0x373   : > { %v867_v31 = vsel %vm250_vm2, %v2591_v27, %v866_v21  ;;  %v869_v32 = vsel %vm250_vm2, %v866_v21, %v2590_v28  ;;  %v855_v33 = vsel %vm237_vm1, %v2586_v29, %v854_v22  ;;  %v857_v10 = vsel %vm237_vm1, %v854_v22, %v2585_v30 }
 0x374   : > { %v2394_v35 = vpack.c.bf16 %v867_v31, %v855_v33  ;;  %v2379_v36 = vpack.c.bf16 %v869_v32, %v857_v10  ;;  %v2599_v37 = vpop.permute.xlu0 %2598  ;;  %v2594_v41 = vpop.permute.xlu1 %2593  ;;  %v856_v42 = vsel %vm237_vm1, %v2585_v30, %v2586_v29  ;;  %v868_v45 = vsel %vm250_vm2, %v2590_v28, %v2591_v27  ;;  %v2113_v28 = vld [vmem:[%s3478_s1 + $0x10] sm:$0xff] }
 0x375   : > { %v2601_v46 = vunpack.i.h.bf16 %v2599_v37  ;;  %v2600_v44 = vunpack.i.l.bf16 %v2599_v37  ;;  %v2596_v47 = vunpack.i.h.bf16 %v2594_v41  ;;  %v2595_v48 = vunpack.i.l.bf16 %v2594_v41 }
 0x376   : > { %v2377_v40 = vpack.c.bf16 %v868_v45, %v856_v42  ;;  %2395 = vmatpush3.bf16.msra.mxu1 %v2394_v35 }
 0x377   : > { %v891_v43 = vsel %vm276_vm3, %v2601_v46, %v890_v23  ;;  %v893_v49 = vsel %vm276_vm3, %v890_v23, %v2600_v44  ;;  %v879_v50 = vsel %vm263_vm4, %v2596_v47, %v878_v24  ;;  %v881_v51 = vsel %vm263_vm4, %v878_v24, %v2595_v48  ;;  %2396 = vmatprep.subr.bf16.mxu1 %v2730_v0 }
 0x378   : > { %v2397_v52 = vpack.c.bf16 %v891_v43, %v879_v50  ;;  %2378 = vmatprep.subr.bf16.mxu0 %v2377_v40  ;;  %v901_v53 = vpop.permute.xlu0 %900  ;;  %v913_v54 = vpop.permute.xlu1 %912  ;;  %v880_v55 = vsel %vm263_vm4, %v2595_v48, %v2596_v47  ;;  %v892_v56 = vsel %vm276_vm3, %v2600_v44, %v2601_v46  ;;  %v2383_v57 = vpack.c.bf16 %v893_v49, %v881_v51 }
 0x379   : > { %2380 = vmatpush1.bf16.msra.mxu0 %v2379_v36  ;;  %v2381_v58 = vpack.c.bf16 %v892_v56, %v880_v55 }
 0x37a   : > { %2398 = vmatpush3.bf16.msra.mxu1 %v2397_v52 }
 0x37b   : > { %2382 = vmatprep.subr.bf16.mxu0 %v2381_v58  ;;  %2399 = vmatprep.subr.bf16.mxu1 %v2730_v0 }
 0x37c   : > { %v2614_v59 = vpop.permute.xlu0 %2613  ;;  %v2604_v60 = vpop.permute.xlu1 %2603 }
 0x37d   : > { %2384 = vmatpush1.bf16.msra.mxu0 %v2383_v57  ;;  %v2606_v61 = vunpack.i.h.bf16 %v2604_v60  ;;  %v2605_v62 = vunpack.i.l.bf16 %v2604_v60  ;;  %v2616_v63 = vunpack.i.h.bf16 %v2614_v59  ;;  %v2615_v3 = vunpack.i.l.bf16 %v2614_v59 }
 0x37f   : > { %v908_v1 = vsel %vm292_vm5, %v2606_v61, %v901_v53  ;;  %v907_v4 = vsel %vm292_vm5, %v901_v53, %v2605_v62  ;;  %v906_v5 = vsel %vm292_vm5, %v2605_v62, %v2606_v61  ;;  %v930_v20 = vsel %vm318_vm6, %v2615_v3, %v2616_v63  ;;  %v2119_v53 = vld [vmem:[%s3479_s2 + $0x18] sm:$0xff] }
 0x380   : > { %v2400_v2 = vpack.c.bf16 %v908_v1, %v3031_v11  ;;  %v2387_v7 = vpack.c.bf16 %v907_v4, %v3038_v15  ;;  %v925_v8 = vpop.permute.xlu0 %924  ;;  %v2609_v9 = vpop.permute.xlu1 %2608  ;;  %v2385_v13 = vpack.c.bf16 %v906_v5, %v3041_v16 }
 0x381   : > { %v2611_v14 = vunpack.i.h.bf16 %v2609_v9  ;;  %v2610_v17 = vunpack.i.l.bf16 %v2609_v9  ;;  %v931_v18 = vsel %vm318_vm6, %v925_v8, %v2615_v3  ;;  %v932_v19 = vsel %vm318_vm6, %v2616_v63, %v925_v8 }
 0x382   : > { %2386 = vmatprep.subr.bf16.mxu0 %v2385_v13  ;;  %2401 = vmatpush3.bf16.msra.mxu1 %v2400_v2 }
 0x383   : > { %v920_v11 = vsel %vm305_vm7, %v2611_v14, %v913_v54  ;;  %v919_v15 = vsel %vm305_vm7, %v913_v54, %v2610_v17  ;;  %2388 = vmatpush1.bf16.msra.mxu0 %v2387_v7  ;;  %2402 = vmatprep.subr.bf16.mxu1 %v2730_v0  ;;  %v918_v16 = vsel %vm305_vm7, %v2610_v17, %v2611_v14  ;;  %v2122_v54 = vld [vmem:[%s3480_s3 + $0x18] sm:$0xff] }
 0x384   : > { %v2403_v21 = vpack.c.bf16 %v932_v19, %v920_v11  ;;  %v2391_v22 = vpack.c.bf16 %v931_v18, %v919_v15  ;;  %v941_v23 = vpop.permute.xlu0 %940  ;;  %v939_v24 = vpop.permute.xlu1 %938  ;;  %v2389_v25 = vpack.c.bf16 %v930_v20, %v918_v16 }
 0x385   : > { %v942_v26 = vsel %vm331_vm8, %v939_v24, %v941_v23 }
 0x386   : > { %2390 = vmatprep.subr.bf16.mxu0 %v2389_v25  ;;  %2404 = vmatpush3.bf16.msra.mxu1 %v2403_v21 }
 0x387   : > { %2392 = vmatpush1.bf16.msra.mxu0 %v2391_v22  ;;  %2253 = vmatprep.subr.mxu1 %v2737_v6 }
 0x388   : > { %v937_v27 = vpop.permute.xlu1 %936  ;;  %1003 = vmatprep.subr.mxu0 %v942_v26 }
 0x389   : > { %v943_v29 = vsel %vm331_vm8, %v937_v27, %v939_v24  ;;  %v944_v30 = vsel %vm331_vm8, %v941_v23, %v937_v27 }
 0x38a   : > { %2254 = vmatpush3.msra.mxu1 %v944_v30 }
 0x38b   : > { %1004 = vmatpush1.msra.mxu0 %v943_v29  ;;  %2256 = vmatmul.mubr.msk.f32.vlgmr.msra.gmra.mrb[4].mxu1 %vm372_vm9, %v2113_v28 }
 0x38c   : > { %2115 = vmatmul.mubr.msk.f32.vlgmr.msra.gmra.mrb[4].mxu0 %vm372_vm9, %v2113_v28  ;;  %2421 = vmatprep.subr.bf16.mxu1 %v2730_v0 }
 0x38d   : > { %2276 = vmatprep.mubr.msk.f32.mxu1 %vm2739_vm0, %v2737_v6  ;;  %1349 = vmatprep.mubr.f32.mxu0 %v2737_v6 }
 0x395   : > { %v982_v31 = vpop.permute.xlu0 %981 }
 0x399   : > { %v1136_v36 = vpop.permute.xlu1 %1135 }
 0x45e   : > { %v1124_v32 = vpop.f32.mrb[4].mxu1 }
 0x45f   : > { %v1125_v33 = vadd.f32 %v1124_v32, %v982_v31  ;;  %v1053_v10 = vpop.f32.mrb[4].mxu0  ;;  %v2257_v35 = vpop.f32.mrb[5].mxu1 }
 0x460   : > { %v1054_v37 = vadd.f32 %v1053_v10, %v982_v31  ;;  %v1055_v41 = vpop.f32.mrb[5].mxu0 }
 0x461   : > { %vm1130_vm10 = vcmp.ge.f32.partialorder %v1125_v33, 0.0  ;;  %v1140_v42 = vmul.f32 %v1136_v36, %v1125_v33  ;;  %v1056_v45 = vadd.f32 %v1055_v41, %v982_v31 }
 0x462   : > { %vm1128_vm11 = vcmp.ge.f32.partialorder %v1054_v37, 0.0  ;;  %v1138_v46 = vmul.f32 %v1136_v36, %v1054_v37 }
 0x463   : > { %v1143_v44 = vsel %vm1130_vm10, %v1125_v33, %v1140_v42  ;;  %vm1129_vm12 = vcmp.ge.f32.partialorder %v1056_v45, 0.0  ;;  %v1139_v47 = vmul.f32 %v1136_v36, %v1056_v45 }
 0x464   : > { %v3141_v48 = vmul.f32 %v1143_v44, %v2914_v34  ;;  %v1141_v40 = vsel %vm1128_vm11, %v1054_v37, %v1138_v46 }
 0x465   : > { %v1142_v43 = vsel %vm1129_vm12, %v1056_v45, %v1139_v47  ;;  %v3148_v49 = vmul.f32 %v1141_v40, %v2916_v38 }
 0x466   : > { %1163 = vrot.lane.b32.xlu1 %v3141_v48, %s2732_s25  ;;  %1151 = vrot.lane.b32.xlu0 %v3141_v48, %s2731_s24  ;;  %v3151_v50 = vmul.f32 %v1142_v43, %v2918_v39 }
 0x468   : > { %v2622_v51 = vpack.i.bf16 %v3151_v50, %v3148_v49  ;;  %v2647_v52 = vpack.i.bf16 %v3141_v48, %v3151_v50 }
 0x46a   : > { %1187 = vrot.lane.b32.xlu1 %v3141_v48, %s2733_s26  ;;  %1175 = vrot.lane.b32.xlu0 %v3141_v48, %s2734_s27 }
 0x46e   : > { %2623 = vrot.lane.b32.xlu1 %v2622_v51, %s2732_s25  ;;  %2618 = vrot.lane.b32.xlu0 %v2622_v51, %s2731_s24 }
 0x472   : > { %2633 = vrot.lane.b32.xlu1 %v2622_v51, %s2733_s26  ;;  %2628 = vrot.lane.b32.xlu0 %v2622_v51, %s2734_s27 }
 0x476   : > { %1198 = vrot.lane.b32.xlu1 %v3148_v49, %s2735_s28  ;;  %1210 = vrot.lane.b32.xlu0 %v3148_v49, %s2738_s30 }
 0x47a   : > { %2648 = vrot.lane.b32.xlu1 %v2647_v52, %s2736_s29  ;;  %2638 = vrot.lane.b32.xlu0 %v2647_v52, %s2735_s28 }
 0x47e   : > { %1222 = vrot.lane.b32.xlu1 %v3148_v49, %s2736_s29  ;;  %2643 = vrot.lane.b32.xlu0 %v2647_v52, %s2738_s30 }
 0x482   : > { %1238 = vrot.lane.b32.xlu1 %v3141_v48, %s2741_s6  ;;  %1236 = vrot.lane.b32.xlu0 %v3151_v50, %s2741_s6 }
 0x486   : > { %1279 = vperm.xlu1 %2545, %v2119_v53   ;;  %1234 = vrot.lane.b32.xlu0 %v3148_v49, %s2741_s6 }
 0x48a   : > { %1433 = vperm.xlu0 %2546, %v2122_v54  }
 0x4d8   : > { %v1164_v55 = vpop.permute.xlu1 %1163  ;;  %v1152_v56 = vpop.permute.xlu0 %1151 }
 0x4dc   : > { %v1188_v57 = vpop.permute.xlu1 %1187  ;;  %v1176_v58 = vpop.permute.xlu0 %1175 }
 0x4e0   : > { %v2624_v59 = vpop.permute.xlu1 %2623  ;;  %v2619_v60 = vpop.permute.xlu0 %2618 }
 0x4e1   : > { %v2626_v61 = vunpack.i.h.bf16 %v2624_v59  ;;  %v2625_v62 = vunpack.i.l.bf16 %v2624_v59  ;;  %v2621_v63 = vunpack.i.h.bf16 %v2619_v60  ;;  %v2620_v3 = vunpack.i.l.bf16 %v2619_v60 }
 0x4e3   : > { %v1165_v1 = vsel %vm250_vm2, %v2626_v61, %v1164_v55  ;;  %v1167_v4 = vsel %vm250_vm2, %v1164_v55, %v2625_v62  ;;  %v1153_v5 = vsel %vm237_vm1, %v2621_v63, %v1152_v56  ;;  %v1155_v2 = vsel %vm237_vm1, %v1152_v56, %v2620_v3 }
 0x4e4   : > { %v2422_v7 = vpack.c.bf16 %v1165_v1, %v1153_v5  ;;  %v2407_v8 = vpack.c.bf16 %v1167_v4, %v1155_v2  ;;  %v2634_v9 = vpop.permute.xlu1 %2633  ;;  %v2629_v13 = vpop.permute.xlu0 %2628  ;;  %v1154_v14 = vsel %vm237_vm1, %v2620_v3, %v2621_v63  ;;  %v1166_v17 = vsel %vm250_vm2, %v2625_v62, %v2626_v61  ;;  %v2118_v62 = vld [vmem:[%s3478_s1 + $0x18] sm:$0xff] }
 0x4e5   : > { %v2636_v18 = vunpack.i.h.bf16 %v2634_v9  ;;  %v2635_v19 = vunpack.i.l.bf16 %v2634_v9  ;;  %v2631_v20 = vunpack.i.h.bf16 %v2629_v13  ;;  %v2630_v11 = vunpack.i.l.bf16 %v2629_v13 }
 0x4e6   : > { %v2405_v15 = vpack.c.bf16 %v1166_v17, %v1154_v14  ;;  %2423 = vmatpush3.bf16.msra.mxu1 %v2422_v7 }
 0x4e7   : > { %v1189_v16 = vsel %vm276_vm3, %v2636_v18, %v1188_v57  ;;  %v1191_v21 = vsel %vm276_vm3, %v1188_v57, %v2635_v19  ;;  %v1177_v22 = vsel %vm263_vm4, %v2631_v20, %v1176_v58  ;;  %v1179_v23 = vsel %vm263_vm4, %v1176_v58, %v2630_v11  ;;  %2424 = vmatprep.subr.bf16.mxu1 %v2730_v0 }
 0x4e8   : > { %v2425_v24 = vpack.c.bf16 %v1189_v16, %v1177_v22  ;;  %2406 = vmatprep.subr.bf16.mxu0 %v2405_v15  ;;  %v1199_v25 = vpop.permute.xlu1 %1198  ;;  %v1211_v26 = vpop.permute.xlu0 %1210  ;;  %v1178_v27 = vsel %vm263_vm4, %v2630_v11, %v2631_v20  ;;  %v1190_v28 = vsel %vm276_vm3, %v2635_v19, %v2636_v18  ;;  %v2411_v29 = vpack.c.bf16 %v1191_v21, %v1179_v23 }
 0x4e9   : > { %2408 = vmatpush1.bf16.msra.mxu0 %v2407_v8  ;;  %v2409_v30 = vpack.c.bf16 %v1190_v28, %v1178_v27 }
 0x4ea   : > { %2426 = vmatpush3.bf16.msra.mxu1 %v2425_v24 }
 0x4eb   : > { %2410 = vmatprep.subr.bf16.mxu0 %v2409_v30  ;;  %2427 = vmatprep.subr.bf16.mxu1 %v2730_v0 }
 0x4ec   : > { %v2649_v31 = vpop.permute.xlu1 %2648  ;;  %v2639_v32 = vpop.permute.xlu0 %2638 }
 0x4ed   : > { %2412 = vmatpush1.bf16.msra.mxu0 %v2411_v29  ;;  %v2641_v33 = vunpack.i.h.bf16 %v2639_v32  ;;  %v2640_v10 = vunpack.i.l.bf16 %v2639_v32  ;;  %v2651_v35 = vunpack.i.h.bf16 %v2649_v31  ;;  %v2650_v36 = vunpack.i.l.bf16 %v2649_v31 }
 0x4ef   : > { %v1206_v37 = vsel %vm292_vm5, %v2641_v33, %v1199_v25  ;;  %v1205_v41 = vsel %vm292_vm5, %v1199_v25, %v2640_v10  ;;  %v1204_v42 = vsel %vm292_vm5, %v2640_v10, %v2641_v33  ;;  %v1228_v54 = vsel %vm318_vm6, %v2650_v36, %v2651_v35  ;;  %v2124_v25 = vld [vmem:[%s3479_s2 + $0x20] sm:$0xff] }
 0x4f0   : > { %v2428_v45 = vpack.c.bf16 %v1206_v37, %v3141_v48  ;;  %v2415_v46 = vpack.c.bf16 %v1205_v41, %v3148_v49  ;;  %v1223_v44 = vpop.permute.xlu1 %1222  ;;  %v2644_v47 = vpop.permute.xlu0 %2643  ;;  %v2413_v40 = vpack.c.bf16 %v1204_v42, %v3151_v50 }
 0x4f1   : > { %v2646_v43 = vunpack.i.h.bf16 %v2644_v47  ;;  %v2645_v51 = vunpack.i.l.bf16 %v2644_v47  ;;  %v1229_v52 = vsel %vm318_vm6, %v1223_v44, %v2650_v36  ;;  %v1230_v53 = vsel %vm318_vm6, %v2651_v35, %v1223_v44 }
 0x4f2   : > { %2414 = vmatprep.subr.bf16.mxu0 %v2413_v40  ;;  %2429 = vmatpush3.bf16.msra.mxu1 %v2428_v45 }
 0x4f3   : > { %v1218_v48 = vsel %vm305_vm7, %v2646_v43, %v1211_v26  ;;  %v1217_v49 = vsel %vm305_vm7, %v1211_v26, %v2645_v51  ;;  %2416 = vmatpush1.bf16.msra.mxu0 %v2415_v46  ;;  %2430 = vmatprep.subr.bf16.mxu1 %v2730_v0  ;;  %v1216_v50 = vsel %vm305_vm7, %v2645_v51, %v2646_v43  ;;  %v2127_v26 = vld [vmem:[%s3480_s3 + $0x20] sm:$0xff] }
 0x4f4   : > { %v2431_v55 = vpack.c.bf16 %v1230_v53, %v1218_v48  ;;  %v2419_v56 = vpack.c.bf16 %v1229_v52, %v1217_v49  ;;  %v1239_v57 = vpop.permute.xlu1 %1238  ;;  %v1237_v58 = vpop.permute.xlu0 %1236  ;;  %v2417_v59 = vpack.c.bf16 %v1228_v54, %v1216_v50 }
 0x4f5   : > { %v1240_v60 = vsel %vm331_vm8, %v1237_v58, %v1239_v57 }
 0x4f6   : > { %2418 = vmatprep.subr.bf16.mxu0 %v2417_v59  ;;  %2432 = vmatpush3.bf16.msra.mxu1 %v2431_v55 }
 0x4f7   : > { %2420 = vmatpush1.bf16.msra.mxu0 %v2419_v56  ;;  %2274 = vmatprep.subr.mxu1 %v2737_v6 }
 0x4f8   : > { %v1235_v61 = vpop.permute.xlu0 %1234  ;;  %1301 = vmatprep.subr.mxu0 %v1240_v60 }
 0x4f9   : > { %v1241_v63 = vsel %vm331_vm8, %v1235_v61, %v1237_v58  ;;  %v1242_v3 = vsel %vm331_vm8, %v1239_v57, %v1235_v61 }
 0x4fa   : > { %2275 = vmatpush3.msra.mxu1 %v1242_v3 }
 0x4fb   : > { %1302 = vmatpush1.msra.mxu0 %v1241_v63  ;;  %2277 = vmatmul.mubr.msk.f32.vlgmr.msra.gmra.mrb[6].mxu1 %vm372_vm9, %v2118_v62 }
 0x4fc   : > { %2120 = vmatmul.mubr.msk.f32.vlgmr.msra.gmra.mrb[6].mxu0 %vm372_vm9, %v2118_v62  ;;  %2449 = vmatprep.subr.bf16.mxu1 %v2730_v0 }
 0x4fd   : > { %2297 = vmatprep.mubr.msk.f32.mxu1 %vm2739_vm0, %v2737_v6  ;;  %1647 = vmatprep.mubr.f32.mxu0 %v2737_v6 }
 0x505   : > { %v1280_v1 = vpop.permute.xlu1 %1279 }
 0x509   : > { %v1434_v8 = vpop.permute.xlu0 %1433 }
 0x5ce   : > { %v1422_v4 = vpop.f32.mrb[6].mxu1 }
 0x5cf   : > { %v1423_v5 = vadd.f32 %v1422_v4, %v1280_v1  ;;  %v1351_v2 = vpop.f32.mrb[6].mxu0  ;;  %v2278_v7 = vpop.f32.mrb[7].mxu1 }
 0x5d0   : > { %v1352_v9 = vadd.f32 %v1351_v2, %v1280_v1  ;;  %v1353_v13 = vpop.f32.mrb[7].mxu0 }
 0x5d1   : > { %vm1428_vm13 = vcmp.ge.f32.partialorder %v1423_v5, 0.0  ;;  %v1438_v14 = vmul.f32 %v1434_v8, %v1423_v5  ;;  %v1354_v17 = vadd.f32 %v1353_v13, %v1280_v1 }
 0x5d2   : > { %vm1426_vm14 = vcmp.ge.f32.partialorder %v1352_v9, 0.0  ;;  %v1436_v18 = vmul.f32 %v1434_v8, %v1352_v9 }
 0x5d3   : > { %v1441_v19 = vsel %vm1428_vm13, %v1423_v5, %v1438_v14  ;;  %vm1427_vm15 = vcmp.ge.f32.partialorder %v1354_v17, 0.0  ;;  %v1437_v20 = vmul.f32 %v1434_v8, %v1354_v17 }
 0x5d4   : > { %v3251_v11 = vmul.f32 %v1441_v19, %v2914_v34  ;;  %v1439_v15 = vsel %vm1426_vm14, %v1352_v9, %v1436_v18 }
 0x5d5   : > { %v1440_v16 = vsel %vm1427_vm15, %v1354_v17, %v1437_v20  ;;  %v3258_v21 = vmul.f32 %v1439_v15, %v2916_v38 }
 0x5d6   : > { %1461 = vrot.lane.b32.xlu0 %v3251_v11, %s2732_s25  ;;  %1449 = vrot.lane.b32.xlu1 %v3251_v11, %s2731_s24  ;;  %v3261_v22 = vmul.f32 %v1440_v16, %v2918_v39 }
 0x5d8   : > { %v2657_v23 = vpack.i.bf16 %v3261_v22, %v3258_v21  ;;  %v2682_v24 = vpack.i.bf16 %v3251_v11, %v3261_v22 }
 0x5da   : > { %1485 = vrot.lane.b32.xlu0 %v3251_v11, %s2733_s26  ;;  %1473 = vrot.lane.b32.xlu1 %v3251_v11, %s2734_s27 }
 0x5de   : > { %2658 = vrot.lane.b32.xlu0 %v2657_v23, %s2732_s25  ;;  %2653 = vrot.lane.b32.xlu1 %v2657_v23, %s2731_s24 }
 0x5e2   : > { %2668 = vrot.lane.b32.xlu0 %v2657_v23, %s2733_s26  ;;  %2663 = vrot.lane.b32.xlu1 %v2657_v23, %s2734_s27 }
 0x5e6   : > { %1496 = vrot.lane.b32.xlu0 %v3258_v21, %s2735_s28  ;;  %1508 = vrot.lane.b32.xlu1 %v3258_v21, %s2738_s30 }
 0x5ea   : > { %2683 = vrot.lane.b32.xlu0 %v2682_v24, %s2736_s29  ;;  %2673 = vrot.lane.b32.xlu1 %v2682_v24, %s2735_s28 }
 0x5ee   : > { %1520 = vrot.lane.b32.xlu0 %v3258_v21, %s2736_s29  ;;  %2678 = vrot.lane.b32.xlu1 %v2682_v24, %s2738_s30 }
 0x5f2   : > { %1536 = vrot.lane.b32.xlu0 %v3251_v11, %s2741_s6  ;;  %1534 = vrot.lane.b32.xlu1 %v3261_v22, %s2741_s6 }
 0x5f6   : > { %1577 = vperm.xlu0 %2546, %v2124_v25   ;;  %1532 = vrot.lane.b32.xlu1 %v3258_v21, %s2741_s6 }
 0x5fa   : > { %1731 = vperm.xlu1 %2545, %v2127_v26  }
 0x648   : > { %v1462_v27 = vpop.permute.xlu0 %1461  ;;  %v1450_v28 = vpop.permute.xlu1 %1449 }
 0x64c   : > { %v1486_v29 = vpop.permute.xlu0 %1485  ;;  %v1474_v30 = vpop.permute.xlu1 %1473 }
 0x650   : > { %v2659_v31 = vpop.permute.xlu0 %2658  ;;  %v2654_v32 = vpop.permute.xlu1 %2653 }
 0x651   : > { %v2661_v33 = vunpack.i.h.bf16 %v2659_v31  ;;  %v2660_v10 = vunpack.i.l.bf16 %v2659_v31  ;;  %v2656_v35 = vunpack.i.h.bf16 %v2654_v32  ;;  %v2655_v36 = vunpack.i.l.bf16 %v2654_v32 }
 0x653   : > { %v1463_v37 = vsel %vm250_vm2, %v2661_v33, %v1462_v27  ;;  %v1465_v41 = vsel %vm250_vm2, %v1462_v27, %v2660_v10  ;;  %v1451_v42 = vsel %vm237_vm1, %v2656_v35, %v1450_v28  ;;  %v1453_v45 = vsel %vm237_vm1, %v1450_v28, %v2655_v36 }
 0x654   : > { %v2450_v46 = vpack.c.bf16 %v1463_v37, %v1451_v42  ;;  %v2435_v44 = vpack.c.bf16 %v1465_v41, %v1453_v45  ;;  %v2669_v47 = vpop.permute.xlu0 %2668  ;;  %v2664_v40 = vpop.permute.xlu1 %2663  ;;  %v1452_v43 = vsel %vm237_vm1, %v2655_v36, %v2656_v35  ;;  %v1464_v51 = vsel %vm250_vm2, %v2660_v10, %v2661_v33  ;;  %v2123_v10 = vld [vmem:[%s3478_s1 + $0x20] sm:$0xff] }
 0x655   : > { %v2671_v52 = vunpack.i.h.bf16 %v2669_v47  ;;  %v2670_v53 = vunpack.i.l.bf16 %v2669_v47  ;;  %v2666_v54 = vunpack.i.h.bf16 %v2664_v40  ;;  %v2665_v48 = vunpack.i.l.bf16 %v2664_v40 }
 0x656   : > { %v2433_v49 = vpack.c.bf16 %v1464_v51, %v1452_v43  ;;  %2451 = vmatpush3.bf16.msra.mxu1 %v2450_v46 }
 0x657   : > { %v1487_v50 = vsel %vm276_vm3, %v2671_v52, %v1486_v29  ;;  %v1489_v55 = vsel %vm276_vm3, %v1486_v29, %v2670_v53  ;;  %v1475_v56 = vsel %vm263_vm4, %v2666_v54, %v1474_v30  ;;  %v1477_v57 = vsel %vm263_vm4, %v1474_v30, %v2665_v48  ;;  %2452 = vmatprep.subr.bf16.mxu1 %v2730_v0 }
 0x658   : > { %v2453_v58 = vpack.c.bf16 %v1487_v50, %v1475_v56  ;;  %2434 = vmatprep.subr.bf16.mxu0 %v2433_v49  ;;  %v1497_v59 = vpop.permute.xlu0 %1496  ;;  %v1509_v60 = vpop.permute.xlu1 %1508  ;;  %v1476_v61 = vsel %vm263_vm4, %v2665_v48, %v2666_v54  ;;  %v1488_v62 = vsel %vm276_vm3, %v2670_v53, %v2671_v52  ;;  %v2439_v63 = vpack.c.bf16 %v1489_v55, %v1477_v57 }
 0x659   : > { %2436 = vmatpush1.bf16.msra.mxu0 %v2435_v44  ;;  %v2437_v3 = vpack.c.bf16 %v1488_v62, %v1476_v61 }
 0x65a   : > { %2454 = vmatpush3.bf16.msra.mxu1 %v2453_v58 }
 0x65b   : > { %2438 = vmatprep.subr.bf16.mxu0 %v2437_v3  ;;  %2455 = vmatprep.subr.bf16.mxu1 %v2730_v0 }
 0x65c   : > { %v2684_v1 = vpop.permute.xlu0 %2683  ;;  %v2674_v4 = vpop.permute.xlu1 %2673 }
 0x65d   : > { %2440 = vmatpush1.bf16.msra.mxu0 %v2439_v63  ;;  %v2676_v5 = vunpack.i.h.bf16 %v2674_v4  ;;  %v2675_v2 = vunpack.i.l.bf16 %v2674_v4  ;;  %v2686_v7 = vunpack.i.h.bf16 %v2684_v1  ;;  %v2685_v8 = vunpack.i.l.bf16 %v2684_v1 }
 0x65f   : > { %v1504_v9 = vsel %vm292_vm5, %v2676_v5, %v1497_v59  ;;  %v1503_v13 = vsel %vm292_vm5, %v1497_v59, %v2675_v2  ;;  %v1502_v14 = vsel %vm292_vm5, %v2675_v2, %v2676_v5  ;;  %v1526_v26 = vsel %vm318_vm6, %v2685_v8, %v2686_v7  ;;  %v2129_v59 = vld [vmem:[%s3479_s2 + $0x28] sm:$0xff] }
 0x660   : > { %v2456_v17 = vpack.c.bf16 %v1504_v9, %v3251_v11  ;;  %v2443_v18 = vpack.c.bf16 %v1503_v13, %v3258_v21  ;;  %v1521_v19 = vpop.permute.xlu0 %1520  ;;  %v2679_v20 = vpop.permute.xlu1 %2678  ;;  %v2441_v15 = vpack.c.bf16 %v1502_v14, %v3261_v22 }
 0x661   : > { %v2681_v16 = vunpack.i.h.bf16 %v2679_v20  ;;  %v2680_v23 = vunpack.i.l.bf16 %v2679_v20  ;;  %v1527_v24 = vsel %vm318_vm6, %v1521_v19, %v2685_v8  ;;  %v1528_v25 = vsel %vm318_vm6, %v2686_v7, %v1521_v19 }
 0x662   : > { %2442 = vmatprep.subr.bf16.mxu0 %v2441_v15  ;;  %2457 = vmatpush3.bf16.msra.mxu1 %v2456_v17 }
 0x663   : > { %v1516_v11 = vsel %vm305_vm7, %v2681_v16, %v1509_v60  ;;  %v1515_v21 = vsel %vm305_vm7, %v1509_v60, %v2680_v23  ;;  %2444 = vmatpush1.bf16.msra.mxu0 %v2443_v18  ;;  %2458 = vmatprep.subr.bf16.mxu1 %v2730_v0  ;;  %v1514_v22 = vsel %vm305_vm7, %v2680_v23, %v2681_v16  ;;  %v2132_v60 = vld [vmem:[%s3480_s3 + $0x28] sm:$0xff] }
 0x664   : > { %v2459_v27 = vpack.c.bf16 %v1528_v25, %v1516_v11  ;;  %v2447_v28 = vpack.c.bf16 %v1527_v24, %v1515_v21  ;;  %v1537_v29 = vpop.permute.xlu0 %1536  ;;  %v1535_v30 = vpop.permute.xlu1 %1534  ;;  %v2445_v31 = vpack.c.bf16 %v1526_v26, %v1514_v22 }
 0x665   : > { %v1538_v32 = vsel %vm331_vm8, %v1535_v30, %v1537_v29 }
 0x666   : > { %2446 = vmatprep.subr.bf16.mxu0 %v2445_v31  ;;  %2460 = vmatpush3.bf16.msra.mxu1 %v2459_v27 }
 0x667   : > { %2448 = vmatpush1.bf16.msra.mxu0 %v2447_v28  ;;  %2295 = vmatprep.subr.mxu1 %v2737_v6 }
 0x668   : > { %v1533_v33 = vpop.permute.xlu1 %1532  ;;  %1599 = vmatprep.subr.mxu0 %v1538_v32 }
 0x669   : > { %v1539_v35 = vsel %vm331_vm8, %v1533_v33, %v1535_v30  ;;  %v1540_v36 = vsel %vm331_vm8, %v1537_v29, %v1533_v33 }
 0x66a   : > { %2296 = vmatpush3.msra.mxu1 %v1540_v36 }
 0x66b   : > { %1600 = vmatpush1.msra.mxu0 %v1539_v35  ;;  %2298 = vmatmul.mubr.msk.f32.vlgmr.msra.gmra.mrb[8].mxu1 %vm372_vm9, %v2123_v10 }
 0x66c   : > { %2125 = vmatmul.mubr.msk.f32.vlgmr.msra.gmra.mrb[8].mxu0 %vm372_vm9, %v2123_v10  ;;  %2477 = vmatprep.subr.bf16.mxu1 %v2730_v0 }
 0x66d   : > { %2318 = vmatprep.mubr.msk.f32.mxu1 %vm2739_vm0, %v2737_v6  ;;  %1945 = vmatprep.mubr.f32.mxu0 %v2737_v6 }
 0x675   : > { %v1578_v37 = vpop.permute.xlu0 %1577 }
 0x679   : > { %v1732_v44 = vpop.permute.xlu1 %1731 }
 0x73e   : > { %v1720_v41 = vpop.f32.mrb[8].mxu1 }
 0x73f   : > { %v1721_v42 = vadd.f32 %v1720_v41, %v1578_v37  ;;  %v1649_v45 = vpop.f32.mrb[8].mxu0  ;;  %v2299_v46 = vpop.f32.mrb[9].mxu1 }
 0x740   : > { %v1650_v47 = vadd.f32 %v1649_v45, %v1578_v37  ;;  %v1651_v40 = vpop.f32.mrb[9].mxu0 }
 0x741   : > { %vm1726_vm10 = vcmp.ge.f32.partialorder %v1721_v42, 0.0  ;;  %v1736_v43 = vmul.f32 %v1732_v44, %v1721_v42  ;;  %v1652_v51 = vadd.f32 %v1651_v40, %v1578_v37 }
 0x742   : > { %vm1724_vm11 = vcmp.ge.f32.partialorder %v1650_v47, 0.0  ;;  %v1734_v52 = vmul.f32 %v1732_v44, %v1650_v47 }
 0x743   : > { %v1739_v53 = vsel %vm1726_vm10, %v1721_v42, %v1736_v43  ;;  %vm1725_vm12 = vcmp.ge.f32.partialorder %v1652_v51, 0.0  ;;  %v1735_v54 = vmul.f32 %v1732_v44, %v1652_v51 }
 0x744   : > { %v3361_v48 = vmul.f32 %v1739_v53, %v2914_v34  ;;  %v1737_v49 = vsel %vm1724_vm11, %v1650_v47, %v1734_v52 }
 0x745   : > { %v1738_v50 = vsel %vm1725_vm12, %v1652_v51, %v1735_v54  ;;  %v3368_v55 = vmul.f32 %v1737_v49, %v2916_v38 }
 0x746   : > { %1759 = vrot.lane.b32.xlu1 %v3361_v48, %s2732_s25  ;;  %1747 = vrot.lane.b32.xlu0 %v3361_v48, %s2731_s24  ;;  %v3371_v56 = vmul.f32 %v1738_v50, %v2918_v39 }
 0x748   : > { %v2692_v57 = vpack.i.bf16 %v3371_v56, %v3368_v55  ;;  %v2717_v58 = vpack.i.bf16 %v3361_v48, %v3371_v56 }
 0x74a   : > { %1783 = vrot.lane.b32.xlu1 %v3361_v48, %s2733_s26  ;;  %1771 = vrot.lane.b32.xlu0 %v3361_v48, %s2734_s27 }
 0x74e   : > { %2693 = vrot.lane.b32.xlu1 %v2692_v57, %s2732_s25  ;;  %2688 = vrot.lane.b32.xlu0 %v2692_v57, %s2731_s24 }
 0x752   : > { %2703 = vrot.lane.b32.xlu1 %v2692_v57, %s2733_s26  ;;  %2698 = vrot.lane.b32.xlu0 %v2692_v57, %s2734_s27 }
 0x756   : > { %1794 = vrot.lane.b32.xlu1 %v3368_v55, %s2735_s28  ;;  %1806 = vrot.lane.b32.xlu0 %v3368_v55, %s2738_s30 }
 0x75a   : > { %2718 = vrot.lane.b32.xlu1 %v2717_v58, %s2736_s29  ;;  %2708 = vrot.lane.b32.xlu0 %v2717_v58, %s2735_s28 }
 0x75e   : > { %1818 = vrot.lane.b32.xlu1 %v3368_v55, %s2736_s29  ;;  %2713 = vrot.lane.b32.xlu0 %v2717_v58, %s2738_s30 }
 0x762   : > { %1834 = vrot.lane.b32.xlu1 %v3361_v48, %s2741_s6  ;;  %1832 = vrot.lane.b32.xlu0 %v3371_v56, %s2741_s6 }
 0x766   : > { %1875 = vperm.xlu1 %2545, %v2129_v59   ;;  %1830 = vrot.lane.b32.xlu0 %v3368_v55, %s2741_s6 }
 0x76a   : > { %2029 = vperm.xlu0 %2546, %v2132_v60  }
 0x7b8   : > { %v1760_v61 = vpop.permute.xlu1 %1759  ;;  %v1748_v62 = vpop.permute.xlu0 %1747 }
 0x7bc   : > { %v1784_v63 = vpop.permute.xlu1 %1783  ;;  %v1772_v3 = vpop.permute.xlu0 %1771 }
 0x7c0   : > { %v2694_v1 = vpop.permute.xlu1 %2693  ;;  %v2689_v4 = vpop.permute.xlu0 %2688 }
 0x7c1   : > { %v2696_v5 = vunpack.i.h.bf16 %v2694_v1  ;;  %v2695_v2 = vunpack.i.l.bf16 %v2694_v1  ;;  %v2691_v7 = vunpack.i.h.bf16 %v2689_v4  ;;  %v2690_v8 = vunpack.i.l.bf16 %v2689_v4 }
 0x7c3   : > { %v1761_v9 = vsel %vm250_vm2, %v2696_v5, %v1760_v61  ;;  %v1763_v13 = vsel %vm250_vm2, %v1760_v61, %v2695_v2  ;;  %v1749_v14 = vsel %vm237_vm1, %v2691_v7, %v1748_v62  ;;  %v1751_v17 = vsel %vm237_vm1, %v1748_v62, %v2690_v8 }
 0x7c4   : > { %v2478_v18 = vpack.c.bf16 %v1761_v9, %v1749_v14  ;;  %v2463_v19 = vpack.c.bf16 %v1763_v13, %v1751_v17  ;;  %v2704_v20 = vpop.permute.xlu1 %2703  ;;  %v2699_v15 = vpop.permute.xlu0 %2698  ;;  %v1750_v16 = vsel %vm237_vm1, %v2690_v8, %v2691_v7  ;;  %v1762_v23 = vsel %vm250_vm2, %v2695_v2, %v2696_v5 }
 0x7c5   : > { %v2706_v24 = vunpack.i.h.bf16 %v2704_v20  ;;  %v2705_v25 = vunpack.i.l.bf16 %v2704_v20  ;;  %v2701_v26 = vunpack.i.h.bf16 %v2699_v15  ;;  %v2700_v11 = vunpack.i.l.bf16 %v2699_v15 }
 0x7c6   : > { %v2461_v21 = vpack.c.bf16 %v1762_v23, %v1750_v16  ;;  %2479 = vmatpush3.bf16.msra.mxu1 %v2478_v18 }
 0x7c7   : > { %v1785_v22 = vsel %vm276_vm3, %v2706_v24, %v1784_v63  ;;  %v1787_v27 = vsel %vm276_vm3, %v1784_v63, %v2705_v25  ;;  %v1773_v28 = vsel %vm263_vm4, %v2701_v26, %v1772_v3  ;;  %v1775_v29 = vsel %vm263_vm4, %v1772_v3, %v2700_v11  ;;  %2480 = vmatprep.subr.bf16.mxu1 %v2730_v0 }
 0x7c8   : > { %v2481_v30 = vpack.c.bf16 %v1785_v22, %v1773_v28  ;;  %2462 = vmatprep.subr.bf16.mxu0 %v2461_v21  ;;  %v1795_v31 = vpop.permute.xlu1 %1794  ;;  %v1807_v32 = vpop.permute.xlu0 %1806  ;;  %v1774_v33 = vsel %vm263_vm4, %v2700_v11, %v2701_v26  ;;  %v1786_v10 = vsel %vm276_vm3, %v2705_v25, %v2706_v24  ;;  %v2467_v35 = vpack.c.bf16 %v1787_v27, %v1775_v29 }
 0x7c9   : > { %2464 = vmatpush1.bf16.msra.mxu0 %v2463_v19  ;;  %v2465_v36 = vpack.c.bf16 %v1786_v10, %v1774_v33 }
 0x7ca   : > { %2482 = vmatpush3.bf16.msra.mxu1 %v2481_v30 }
 0x7cb   : > { %2466 = vmatprep.subr.bf16.mxu0 %v2465_v36  ;;  %2483 = vmatprep.subr.bf16.mxu1 %v2730_v0 }
 0x7cc   : > { %v2719_v37 = vpop.permute.xlu1 %2718  ;;  %v2709_v41 = vpop.permute.xlu0 %2708 }
 0x7cd   : > { %2468 = vmatpush1.bf16.msra.mxu0 %v2467_v35  ;;  %v2711_v42 = vunpack.i.h.bf16 %v2709_v41  ;;  %v2710_v45 = vunpack.i.l.bf16 %v2709_v41  ;;  %v2721_v46 = vunpack.i.h.bf16 %v2719_v37  ;;  %v2720_v44 = vunpack.i.l.bf16 %v2719_v37 }
 0x7cf   : > { %v1802_v47 = vsel %vm292_vm5, %v2711_v42, %v1795_v31  ;;  %v1801_v40 = vsel %vm292_vm5, %v1795_v31, %v2710_v45  ;;  %v1800_v43 = vsel %vm292_vm5, %v2710_v45, %v2711_v42  ;;  %v1824_v60 = vsel %vm318_vm6, %v2720_v44, %v2721_v46 }
 0x7d0   : > { %v2484_v51 = vpack.c.bf16 %v1802_v47, %v3361_v48  ;;  %v2471_v52 = vpack.c.bf16 %v1801_v40, %v3368_v55  ;;  %v1819_v53 = vpop.permute.xlu1 %1818  ;;  %v2714_v54 = vpop.permute.xlu0 %2713  ;;  %v2469_v49 = vpack.c.bf16 %v1800_v43, %v3371_v56 }
 0x7d1   : > { %v2716_v50 = vunpack.i.h.bf16 %v2714_v54  ;;  %v2715_v57 = vunpack.i.l.bf16 %v2714_v54  ;;  %v1825_v58 = vsel %vm318_vm6, %v1819_v53, %v2720_v44  ;;  %v1826_v59 = vsel %vm318_vm6, %v2721_v46, %v1819_v53 }
 0x7d2   : > { %2470 = vmatprep.subr.bf16.mxu0 %v2469_v49  ;;  %2485 = vmatpush3.bf16.msra.mxu1 %v2484_v51 }
 0x7d3   : > { %v1814_v48 = vsel %vm305_vm7, %v2716_v50, %v1807_v32  ;;  %v1813_v55 = vsel %vm305_vm7, %v1807_v32, %v2715_v57  ;;  %2472 = vmatpush1.bf16.msra.mxu0 %v2471_v52  ;;  %2486 = vmatprep.subr.bf16.mxu1 %v2730_v0  ;;  %v1812_v56 = vsel %vm305_vm7, %v2715_v57, %v2716_v50  ;;  %v2128_v0 = vld [vmem:[%s3478_s1 + $0x28] sm:$0xff] }
 0x7d4   : > { %v2487_v61 = vpack.c.bf16 %v1826_v59, %v1814_v48  ;;  %v2475_v62 = vpack.c.bf16 %v1825_v58, %v1813_v55  ;;  %v1835_v63 = vpop.permute.xlu1 %1834  ;;  %v1833_v3 = vpop.permute.xlu0 %1832  ;;  %v2473_v1 = vpack.c.bf16 %v1824_v60, %v1812_v56 }
 0x7d5   : > { %v1836_v4 = vsel %vm331_vm8, %v1833_v3, %v1835_v63 }
 0x7d6   : > { %2474 = vmatprep.subr.bf16.mxu0 %v2473_v1  ;;  %2488 = vmatpush3.bf16.msra.mxu1 %v2487_v61 }
 0x7d7   : > { %2476 = vmatpush1.bf16.msra.mxu0 %v2475_v62  ;;  %2316 = vmatprep.subr.mxu1 %v2737_v6 }
 0x7d8   : > { %v1831_v5 = vpop.permute.xlu0 %1830  ;;  %1897 = vmatprep.subr.mxu0 %v1836_v4 }
 0x7d9   : > { %v1837_v2 = vsel %vm331_vm8, %v1831_v5, %v1833_v3  ;;  %v1838_v7 = vsel %vm331_vm8, %v1835_v63, %v1831_v5 }
 0x7da   : > { %2317 = vmatpush3.msra.mxu1 %v1838_v7 }
 0x7db   : > { %1898 = vmatpush1.msra.mxu0 %v1837_v2  ;;  %2319 = vmatmul.mubr.msk.f32.vlgmr.msra.gmra.mrb[10].mxu1 %vm372_vm9, %v2128_v0 }
 0x7dc   : > { %2130 = vmatmul.mubr.msk.f32.vlgmr.msra.gmra.mrb[10].mxu0 %vm372_vm9, %v2128_v0 }
 0x7e5   : > { %v1876_v6 = vpop.permute.xlu1 %1875 }
 0x7e9   : > { %v2030_v17 = vpop.permute.xlu0 %2029 }
 0x8ae   : > { %v2018_v8 = vpop.f32.mrb[10].mxu1 }
 0x8af   : > { %v2019_v9 = vadd.f32 %v2018_v8, %v1876_v6  ;;  %v1947_v13 = vpop.f32.mrb[10].mxu0  ;;  %v2320_v14 = vpop.f32.mrb[11].mxu1 }
 0x8b0   : > { %v1948_v18 = vadd.f32 %v1947_v13, %v1876_v6  ;;  %v1949_v19 = vpop.f32.mrb[11].mxu0 }
 0x8b1   : > { %vm2024_vm0 = vcmp.ge.f32.partialorder %v2019_v9, 0.0  ;;  %v2034_v20 = vmul.f32 %v2030_v17, %v2019_v9  ;;  %v1950_v15 = vadd.f32 %v1949_v19, %v1876_v6 }
 0x8b2   : > { %vm2022_vm1 = vcmp.ge.f32.partialorder %v1948_v18, 0.0  ;;  %v2032_v12 = vmul.f32 %v2030_v17, %v1948_v18 }
 0x8b3   : > { %v2037_v16 = vsel %vm2024_vm0, %v2019_v9, %v2034_v20  ;;  %vm2023_vm2 = vcmp.ge.f32.partialorder %v1950_v15, 0.0  ;;  %v2033_v23 = vmul.f32 %v2030_v17, %v1950_v15 }
 0x8b4   : > { %v2040_v24 = vmul.f32 %v2037_v16, %v2914_v34  ;;  %v2035_v25 = vsel %vm2022_vm1, %v1948_v18, %v2032_v12 }
 0x8b5   : > { %v2038_v26 = vmul.f32 %v2035_v25, %v2916_v38  ;;  %v2036_v11 = vsel %vm2023_vm2, %v1950_v15, %v2033_v23 }
 0x8b6   : > { %2043 = vst [vmem:[%s224_s11 + $0x10] sm:$0xff] %v2040_v24  ;;  %v2039_v21 = vmul.f32 %v2036_v11, %v2918_v39 }
 0x8b7   : > { %2041 = vst [vmem:[%s224_s11] sm:$0xff] %v2038_v26 }
 0x8b8   : > { %2042 = vst [vmem:[%s224_s11 + $0x8] sm:$0xff] %v2039_v21 }
 0x8b9 PF: > { %s15_s18 = sadd.s32 1, %s2728_s18  }
 0x8ba   : > { %p12_p4 = scmp.ge.s32.totalorder %s15_s18, 4  }
 0x8bc   :  { %14 = sbr.rel (!%p12_p4) target bundleno = 1 (0x1), region = 85 }

</bundles_post_ra>
